<compile_context>
chip_gen: v5e
topology: v5e:2x2
jax: 0.10.0
libtpu: 0.0.40
codegen_flags: <defaults>
</compile_context>

<pallas_src>
import functools

import jax
import jax.numpy as jnp
from jax.experimental import pallas as pl
from jax.experimental.pallas import tpu as pltpu

K = 5          # conv kernel size
COUT = 128     # out_channels of conv1
EPS = 1e-5     # BatchNorm eps


def _conv_kernel(p_ref, w_ref, b_ref, y_ref, sum_ref, sq_ref, *, m_total, tile_m):
    """One lane-dense matmul per grid step + masked per-tile BN partial statistics.

    p_ref   : (TM, KDp)   im2col patches (contraction dim zero-padded to KDp)
    w_ref   : (KDp, COUT) reshaped/padded conv weights
    b_ref   : (1, COUT)   conv bias
    y_ref   : (TM, COUT)  conv output rows (flattened N*H*W)
    sum_ref : (8, COUT)   per-tile partial sum   (real value in sublane 0)
    sq_ref  : (8, COUT)   per-tile partial sum-of-squares (sublane 0)
    """
    i = pl.program_id(0)

    acc = jnp.dot(p_ref[...], w_ref[...], preferred_element_type=jnp.float32)
    acc = acc + b_ref[...]                       # (1, COUT) broadcasts over rows
    y_ref[...] = acc

    # Mask rows past the real row count (zero-padded tail of the last tile).
    row = i * tile_m + jax.lax.broadcasted_iota(jnp.int32, (tile_m, 1), 0)
    valid = (row < m_total).astype(jnp.float32)
    av = acc * valid
    s = jnp.sum(av, axis=0, keepdims=True)       # (1, COUT)
    q = jnp.sum(av * acc, axis=0, keepdims=True)
    sum_ref[...] = jnp.broadcast_to(s, (8, COUT))
    sq_ref[...] = jnp.broadcast_to(q, (8, COUT))


def _bn_relu_kernel(y_ref, scale_ref, shift_ref, o_ref):
    """Fused affine batch-norm + ReLU on a large flat (TB, COUT) row tile."""
    o_ref[...] = jnp.maximum(y_ref[...] * scale_ref[...] + shift_ref[...], 0.0)


@jax.jit
def conv_layer_forward(x_nchw, w, b, gamma, beta):
    """Forward pass of ConvLayer (training-mode BatchNorm, batch statistics)."""
    N, Cin, H, W = x_nchw.shape
    pad = (K - 1) // 2                            # 'same', stride 1
    KD = K * K * Cin
    KDp = ((KD + 127) // 128) * 128               # lane-dense contraction dim
    M = N * H * W
    TM = 512                                      # matmul rows per grid step
    Mp = ((M + TM - 1) // TM) * TM
    ntiles = Mp // TM

    # --- wrapper-side layout: NCHW -> NHWC, pad, im2col (lane-dense) ---
    # TODO(synk): accept NHWC directly from callers to skip this transpose/pad HBM pass.
    x = jnp.transpose(x_nchw, (0, 2, 3, 1)).astype(jnp.float32)
    x_pad = jnp.pad(x, ((0, 0), (pad, pad), (pad, pad), (0, 0)))
    taps = [x_pad[:, kh:kh + H, kw:kw + W, :] for kh in range(K) for kw in range(K)]
    patches = jnp.concatenate(taps, axis=-1).reshape(M, KD)    # (M, K*K*Cin)
    patches = jnp.pad(patches, ((0, Mp - M), (0, KDp - KD)))   # (Mp, KDp)

    # (K, K, Cin, COUT) -> (K*K*Cin, COUT), ordering matches the tap concatenation.
    w2 = jnp.pad(w.astype(jnp.float32).reshape(KD, COUT), ((0, KDp - KD), (0, 0)))
    b2 = b.astype(jnp.float32).reshape(1, COUT)

    conv_kern = functools.partial(_conv_kernel, m_total=M, tile_m=TM)
    y, psum, psq = pl.pallas_call(
        conv_kern,
        out_shape=(
            jax.ShapeDtypeStruct((Mp, COUT), jnp.float32),
            jax.ShapeDtypeStruct((8 * ntiles, COUT), jnp.float32),
            jax.ShapeDtypeStruct((8 * ntiles, COUT), jnp.float32),
        ),
        grid_spec=pltpu.PrefetchScalarGridSpec(
            num_scalar_prefetch=0,
            grid=(ntiles,),
            in_specs=[
                pl.BlockSpec((TM, KDp), lambda i: (i, 0)),
                pl.BlockSpec((KDp, COUT), lambda i: (0, 0)),
                pl.BlockSpec((1, COUT), lambda i: (0, 0)),
            ],
            out_specs=(
                pl.BlockSpec((TM, COUT), lambda i: (i, 0)),
                pl.BlockSpec((8, COUT), lambda i: (i, 0)),
                pl.BlockSpec((8, COUT), lambda i: (i, 0)),
            ),
        ),
        compiler_params=pltpu.CompilerParams(
            dimension_semantics=("parallel",)),
        cost_estimate=pl.CostEstimate(
            flops=2 * Mp * KDp * COUT,
            transcendentals=0,
            bytes_accessed=4 * (Mp * KDp + KDp * COUT + COUT
                                + Mp * COUT + 2 * 8 * ntiles * COUT),
        ),
    )(patches, w2, b2)

    # --- BatchNorm statistics (training mode: biased variance over N*H*W) ---
    csum = jnp.sum(psum.reshape(ntiles, 8, COUT)[:, 0, :], axis=0)
    csq = jnp.sum(psq.reshape(ntiles, 8, COUT)[:, 0, :], axis=0)
    count = float(M)
    mean = csum / count
    var = jnp.maximum(csq / count - mean * mean, 0.0)   # clamp: guards E[y^2]-E[y]^2 < 0
    scale = gamma.astype(jnp.float32) * jax.lax.rsqrt(var + EPS)
    shift = beta.astype(jnp.float32) - mean * scale
    # TODO(synk): running_mean/running_var momentum update is a training side effect
    #             and does not affect the returned activation; not materialized here.

    # --- Fused BN + ReLU over large flat row tiles, in-place over y ---
    TB = TM
    for cand in (4096, 2048, 1024):
        if Mp % cand == 0:
            TB = cand
            break
    out_flat = pl.pallas_call(
        _bn_relu_kernel,
        out_shape=jax.ShapeDtypeStruct((Mp, COUT), jnp.float32),
        grid_spec=pltpu.PrefetchScalarGridSpec(
            num_scalar_prefetch=0,
            grid=(Mp // TB,),
            in_specs=[
                pl.BlockSpec((TB, COUT), lambda i: (i, 0)),
                pl.BlockSpec((1, COUT), lambda i: (0, 0)),
                pl.BlockSpec((1, COUT), lambda i: (0, 0)),
            ],
            out_specs=pl.BlockSpec((TB, COUT), lambda i: (i, 0)),
        ),
        compiler_params=pltpu.CompilerParams(
            dimension_semantics=("parallel",)),
        input_output_aliases={0: 0},
    )(y, scale.reshape(1, COUT), shift.reshape(1, COUT))

    out_nhwc = out_flat[:M].reshape(N, H, W, COUT)
    return jnp.transpose(out_nhwc, (0, 3, 1, 2))            # back to NCHW


def _reference_forward(x_nchw, w, b, gamma, beta):
    """Pure-JAX reference (sanity check only)."""
    w_oihw = jnp.transpose(w, (3, 2, 0, 1))  # (K,K,Cin,COUT) -> (COUT,Cin,K,K)
    y = jax.lax.conv_general_dilated(
        x_nchw.astype(jnp.float32), w_oihw.astype(jnp.float32),
        window_strides=(1, 1), padding="SAME",
        dimension_numbers=("NCHW", "OIHW", "NCHW"))
    y = y + b.reshape(1, COUT, 1, 1)
    mean = jnp.mean(y, axis=(0, 2, 3), keepdims=True)
    var = jnp.mean((y - mean) ** 2, axis=(0, 2, 3), keepdims=True)
    yn = (y - mean) * jax.lax.rsqrt(var + EPS)
    yn = yn * gamma.reshape(1, COUT, 1, 1) + beta.reshape(1, COUT, 1, 1)
    return jnp.maximum(yn, 0.0)


if __name__ == "__main__":
    key = jax.random.PRNGKey(0)
    k_x, k_w, k_b = jax.random.split(key, 3)

    N, Cin, H, W = 2, 4, 16, 16
    x = jax.random.normal(k_x, (N, Cin, H, W), dtype=jnp.float32)

    # Deterministic synthetic parameters (Conv2d(Cin, 128, 5) + BatchNorm2d(128) defaults).
    w = 0.1 * jax.random.normal(k_w, (K, K, Cin, COUT), dtype=jnp.float32)  # HWIO
    b = 0.1 * jax.random.normal(k_b, (COUT,), dtype=jnp.float32)
    gamma = jnp.ones((COUT,), dtype=jnp.float32)   # BN weight init
    beta = jnp.zeros((COUT,), dtype=jnp.float32)   # BN bias init

    out = conv_layer_forward(x, w, b, gamma, beta)
    out = jax.block_until_ready(out)

    ref = _reference_forward(x, w, b, gamma, beta)
    assert out.shape == (N, COUT, H, W)
    assert jnp.allclose(out, ref, rtol=1e-2, atol=1e-2)

    print("KERNEL_OK")
</pallas_src>

<mosaic_0001>
module attributes {stable_mosaic.version = 11 : i64} {
  func.func @_conv_kernel(%arg0: i32, %arg1: memref<512x128xf32, #tpu.memory_space<vmem>>, %arg2: memref<128x128xf32, #tpu.memory_space<vmem>>, %arg3: memref<1x128xf32, #tpu.memory_space<vmem>>, %arg4: memref<512x128xf32, #tpu.memory_space<vmem>>, %arg5: memref<8x128xf32, #tpu.memory_space<vmem>>, %arg6: memref<8x128xf32, #tpu.memory_space<vmem>>) attributes {dimension_semantics = [#tpu.dimension_semantics<parallel>], iteration_bounds = array<i64: 1>, scalar_prefetch = 0 : i64, scratch_operands = 0 : i64, tpu.core_type = #tpu.core_type<tc>, window_params = [{transform_indices = @transform_0, window_bounds = array<i64: 512, 128>}, {pipeline_mode = #tpu.pipeline_mode<synchronous>, transform_indices = @transform_1, window_bounds = array<i64: 128, 128>}, {pipeline_mode = #tpu.pipeline_mode<synchronous>, transform_indices = @transform_2, window_bounds = array<i64: 1, 128>}, {transform_indices = @transform_3, window_bounds = array<i64: 512, 128>}, {transform_indices = @transform_4, window_bounds = array<i64: 8, 128>}, {transform_indices = @transform_5, window_bounds = array<i64: 8, 128>}]} {
    %c0 = arith.constant 0 : index
    %c0_0 = arith.constant 0 : index
    %0 = vector.load %arg1[%c0, %c0_0] : memref<512x128xf32, #tpu.memory_space<vmem>>, vector<512x128xf32>
    %c0_1 = arith.constant 0 : index
    %c0_2 = arith.constant 0 : index
    %1 = vector.load %arg2[%c0_1, %c0_2] : memref<128x128xf32, #tpu.memory_space<vmem>>, vector<128x128xf32>
    %cst = arith.constant dense<0.000000e+00> : vector<512x128xf32>
    %2 = tpu.matmul %0, %1, %cst {dimension_numbers = #tpu.dot_dimension_numbers<[1], [0], [0], [1], [0, 0, 1, 1], [], []>} : vector<512x128xf32>, vector<128x128xf32>, vector<512x128xf32> -> vector<512x128xf32>
    %c0_3 = arith.constant 0 : index
    %c0_4 = arith.constant 0 : index
    %3 = vector.load %arg3[%c0_3, %c0_4] : memref<1x128xf32, #tpu.memory_space<vmem>>, vector<1x128xf32>
    %4 = vector.broadcast %3 : vector<1x128xf32> to vector<512x128xf32>
    %5 = arith.addf %2, %4 : vector<512x128xf32>
    %c0_5 = arith.constant 0 : index
    %c0_6 = arith.constant 0 : index
    %6 = vector.load %arg4[%c0_5, %c0_6] : memref<512x128xf32, #tpu.memory_space<vmem>>, vector<512x128xf32>
    tpu.vector_store %arg4[%c0_5, %c0_6], %5 {strides = array<i32>} : memref<512x128xf32, #tpu.memory_space<vmem>>, vector<512x128xf32>,
    %c512_i32 = arith.constant 512 : i32
    %7 = arith.muli %arg0, %c512_i32 : i32
    %8 = tpu.iota {dimensions = array<i32: 0>} : vector<512x1xi32>
    %9 = vector.broadcast %7 : i32 to vector<512x1xi32>
    %10 = arith.addi %9, %8 : vector<512x1xi32>
    %c512_i32_7 = arith.constant 512 : i32
    %11 = vector.broadcast %c512_i32_7 : i32 to vector<512x1xi32>
    %12 = arith.cmpi slt, %10, %11 : vector<512x1xi32>
    %13 = arith.extui %12 : vector<512x1xi1> to vector<512x1xi32>
    %14 = arith.sitofp %13 : vector<512x1xi32> to vector<512x1xf32>
    %15 = vector.broadcast %14 : vector<512x1xf32> to vector<512x128xf32>
    %16 = arith.mulf %5, %15 : vector<512x128xf32>
    %cst_8 = arith.constant dense<0.000000e+00> : vector<128xf32>
    %17 = vector.multi_reduction <add>, %16, %cst_8 [0] : vector<512x128xf32> to vector<128xf32>
    %18 = vector.shape_cast %17 : vector<128xf32> to vector<1x128xf32>
    %19 = arith.mulf %16, %5 : vector<512x128xf32>
    %cst_9 = arith.constant dense<0.000000e+00> : vector<128xf32>
    %20 = vector.multi_reduction <add>, %19, %cst_9 [0] : vector<512x128xf32> to vector<128xf32>
    %21 = vector.shape_cast %20 : vector<128xf32> to vector<1x128xf32>
    %22 = vector.shape_cast %18 : vector<1x128xf32> to vector<1x128xf32>
    %23 = vector.broadcast %22 : vector<1x128xf32> to vector<8x128xf32>
    %c0_10 = arith.constant 0 : index
    %c0_11 = arith.constant 0 : index
    %24 = vector.load %arg5[%c0_10, %c0_11] : memref<8x128xf32, #tpu.memory_space<vmem>>, vector<8x128xf32>
    tpu.vector_store %arg5[%c0_10, %c0_11], %23 {strides = array<i32>} : memref<8x128xf32, #tpu.memory_space<vmem>>, vector<8x128xf32>,
    %25 = vector.shape_cast %21 : vector<1x128xf32> to vector<1x128xf32>
    %26 = vector.broadcast %25 : vector<1x128xf32> to vector<8x128xf32>
    %c0_12 = arith.constant 0 : index
    %c0_13 = arith.constant 0 : index
    %27 = vector.load %arg6[%c0_12, %c0_13] : memref<8x128xf32, #tpu.memory_space<vmem>>, vector<8x128xf32>
    tpu.vector_store %arg6[%c0_12, %c0_13], %26 {strides = array<i32>} : memref<8x128xf32, #tpu.memory_space<vmem>>, vector<8x128xf32>,
    return
  }
  func.func @transform_0(%arg0: i32) -> (i32, i32) {
    %c0_i32 = arith.constant 0 : i32
    %c0_i32_0 = arith.constant 0 : i32
    return %arg0, %c0_i32 : i32, i32
  }
  func.func @transform_1(%arg0: i32) -> (i32, i32) {
    %c0_i32 = arith.constant 0 : i32
    %c0_i32_0 = arith.constant 0 : i32
    %c0_i32_1 = arith.constant 0 : i32
    return %c0_i32, %c0_i32_0 : i32, i32
  }
  func.func @transform_2(%arg0: i32) -> (i32, i32) {
    %c0_i32 = arith.constant 0 : i32
    %c0_i32_0 = arith.constant 0 : i32
    %c0_i32_1 = arith.constant 0 : i32
    return %c0_i32, %c0_i32_0 : i32, i32
  }
  func.func @transform_3(%arg0: i32) -> (i32, i32) {
    %c0_i32 = arith.constant 0 : i32
    %c0_i32_0 = arith.constant 0 : i32
    return %arg0, %c0_i32 : i32, i32
  }
  func.func @transform_4(%arg0: i32) -> (i32, i32) {
    %c0_i32 = arith.constant 0 : i32
    %c0_i32_0 = arith.constant 0 : i32
    return %arg0, %c0_i32 : i32, i32
  }
  func.func @transform_5(%arg0: i32) -> (i32, i32) {
    %c0_i32 = arith.constant 0 : i32
    %c0_i32_0 = arith.constant 0 : i32
    return %arg0, %c0_i32 : i32, i32
  }
}

module attributes {stable_mosaic.version = 11 : i64} {
  func.func @_bn_relu_kernel(%arg0: i32, %arg1: memref<512x128xf32, #tpu.memory_space<vmem>>, %arg2: memref<1x128xf32, #tpu.memory_space<vmem>>, %arg3: memref<1x128xf32, #tpu.memory_space<vmem>>, %arg4: memref<512x128xf32, #tpu.memory_space<vmem>>) attributes {dimension_semantics = [#tpu.dimension_semantics<parallel>], iteration_bounds = array<i64: 1>, scalar_prefetch = 0 : i64, scratch_operands = 0 : i64, tpu.core_type = #tpu.core_type<tc>, window_params = [{transform_indices = @transform_0, window_bounds = array<i64: 512, 128>}, {pipeline_mode = #tpu.pipeline_mode<synchronous>, transform_indices = @transform_1, window_bounds = array<i64: 1, 128>}, {pipeline_mode = #tpu.pipeline_mode<synchronous>, transform_indices = @transform_2, window_bounds = array<i64: 1, 128>}, {transform_indices = @transform_3, window_bounds = array<i64: 512, 128>}]} {
    %c0 = arith.constant 0 : index
    %c0_0 = arith.constant 0 : index
    %0 = vector.load %arg1[%c0, %c0_0] : memref<512x128xf32, #tpu.memory_space<vmem>>, vector<512x128xf32>
    %c0_1 = arith.constant 0 : index
    %c0_2 = arith.constant 0 : index
    %1 = vector.load %arg2[%c0_1, %c0_2] : memref<1x128xf32, #tpu.memory_space<vmem>>, vector<1x128xf32>
    %2 = vector.broadcast %1 : vector<1x128xf32> to vector<512x128xf32>
    %3 = arith.mulf %0, %2 : vector<512x128xf32>
    %c0_3 = arith.constant 0 : index
    %c0_4 = arith.constant 0 : index
    %4 = vector.load %arg3[%c0_3, %c0_4] : memref<1x128xf32, #tpu.memory_space<vmem>>, vector<1x128xf32>
    %5 = vector.broadcast %4 : vector<1x128xf32> to vector<512x128xf32>
    %6 = arith.addf %3, %5 : vector<512x128xf32>
    %cst = arith.constant 0.000000e+00 : f32
    %7 = vector.broadcast %cst : f32 to vector<512x128xf32>
    %8 = arith.maximumf %6, %7 : vector<512x128xf32>
    %c0_5 = arith.constant 0 : index
    %c0_6 = arith.constant 0 : index
    %9 = vector.load %arg4[%c0_5, %c0_6] : memref<512x128xf32, #tpu.memory_space<vmem>>, vector<512x128xf32>
    tpu.vector_store %arg4[%c0_5, %c0_6], %8 {strides = array<i32>} : memref<512x128xf32, #tpu.memory_space<vmem>>, vector<512x128xf32>,
    return
  }
  func.func @transform_0(%arg0: i32) -> (i32, i32) {
    %c0_i32 = arith.constant 0 : i32
    %c0_i32_0 = arith.constant 0 : i32
    return %arg0, %c0_i32 : i32, i32
  }
  func.func @transform_1(%arg0: i32) -> (i32, i32) {
    %c0_i32 = arith.constant 0 : i32
    %c0_i32_0 = arith.constant 0 : i32
    %c0_i32_1 = arith.constant 0 : i32
    return %c0_i32, %c0_i32_0 : i32, i32
  }
  func.func @transform_2(%arg0: i32) -> (i32, i32) {
    %c0_i32 = arith.constant 0 : i32
    %c0_i32_0 = arith.constant 0 : i32
    %c0_i32_1 = arith.constant 0 : i32
    return %c0_i32, %c0_i32_0 : i32, i32
  }
  func.func @transform_3(%arg0: i32) -> (i32, i32) {
    %c0_i32 = arith.constant 0 : i32
    %c0_i32_0 = arith.constant 0 : i32
    return %arg0, %c0_i32 : i32, i32
  }
}

</mosaic_0001>

<bundles_post_ra>
// kernel: conv_layer_forward.3
= control target key start
LH: loop header
LB: loop body
LE: loop exit
PB: predicated region body
PF: predicated region fallthrough
CT: control target
= control target key end

     0   :  { %s893_s0 = inlined_call_operand.vmem [shape: f32[512,128], index: 0, kind: input, shape index: {}, may-alias: {0,3}]   ;;  %s894_s1 = inlined_call_operand.vmem [shape: f32[1,128], index: 1, kind: input, shape index: {}]   ;;  %s895_s2 = inlined_call_operand.vmem [shape: f32[1,128], index: 2, kind: input, shape index: {}]   ;;  %s896_s3 = inlined_call_operand.vmem [shape: f32[512,128], index: 3, kind: output, shape index: {}, may-alias: {0,3}]  }
   0x1   :  { %v14_v0 = vld [vmem:[%s893_s0] sm:$0xff]  ;;  %v15_v3 = vld [vmem:[%s893_s0 + $0x8] sm:$0xff]  ;;  %v16_v6 = vld [vmem:[%s893_s0 + $0x10] sm:$0xff] }
   0x2   :  { %v374_v1 = vld [vmem:[%s894_s1] ss:$0 sm:$0xff]  ;;  %v17_v7 = vld [vmem:[%s893_s0 + $0x18] sm:$0xff]  ;;  %v19_v12 = vld [vmem:[%s893_s0 + $0x28] sm:$0xff] }
   0x3   :  { %v379_v2 = vld [vmem:[%s895_s2] ss:$0 sm:$0xff]  ;;  %v82_v4 = vmul.f32 %v374_v1, %v14_v0  ;;  %v83_v5 = vmul.f32 %v374_v1, %v15_v3  ;;  %v84_v9 = vmul.f32 %v374_v1, %v16_v6  ;;  %v85_v10 = vmul.f32 %v374_v1, %v17_v7  ;;  %v20_v13 = vld [vmem:[%s893_s0 + $0x30] sm:$0xff]  ;;  %v21_v14 = vld [vmem:[%s893_s0 + $0x38] sm:$0xff] }
   0x4   :  { %v18_v8 = vld [vmem:[%s893_s0 + $0x20] sm:$0xff]  ;;  %v87_v17 = vmul.f32 %v374_v1, %v19_v12  ;;  %v88_v18 = vmul.f32 %v374_v1, %v20_v13  ;;  %v89_v22 = vmul.f32 %v374_v1, %v21_v14  ;;  %v23_v24 = vld [vmem:[%s893_s0 + $0x48] sm:$0xff]  ;;  %v24_v29 = vld [vmem:[%s893_s0 + $0x50] sm:$0xff] }
   0x5   :  { %v86_v11 = vmul.f32 %v374_v1, %v18_v8  ;;  %v150_v15 = vadd.f32 %v379_v2, %v82_v4  ;;  %v151_v16 = vadd.f32 %v379_v2, %v83_v5  ;;  %v152_v19 = vadd.f32 %v379_v2, %v84_v9  ;;  %v22_v23 = vld [vmem:[%s893_s0 + $0x40] sm:$0xff]  ;;  %v25_v30 = vld [vmem:[%s893_s0 + $0x58] sm:$0xff]  ;;  %v27_v35 = vld [vmem:[%s893_s0 + $0x68] sm:$0xff] }
   0x6   :  { %v153_v20 = vadd.f32 %v379_v2, %v85_v10  ;;  %v155_v27 = vadd.f32 %v379_v2, %v87_v17  ;;  %v156_v28 = vadd.f32 %v379_v2, %v88_v18  ;;  %v26_v31 = vld [vmem:[%s893_s0 + $0x60] sm:$0xff]  ;;  %v157_v34 = vadd.f32 %v379_v2, %v89_v22  ;;  %v28_v36 = vld [vmem:[%s893_s0 + $0x70] sm:$0xff] }
   0x7   :  { %v154_v21 = vadd.f32 %v379_v2, %v86_v11  ;;  %v214_v25 = vmax.f32 %v150_v15, 0.0  ;;  %v215_v26 = vmax.f32 %v151_v16, 0.0  ;;  %v216_v32 = vmax.f32 %v152_v19, 0.0 }
   0x8   :  { %v217_v33 = vmax.f32 %v153_v20, 0.0  ;;  %v219_v38 = vmax.f32 %v155_v27, 0.0  ;;  %v90_v39 = vmul.f32 %v374_v1, %v22_v23  ;;  %v91_v40 = vmul.f32 %v374_v1, %v23_v24 }
   0x9   :  { %278 = vst [vmem:[%s896_s3] sm:$0xff] %v214_v25  ;;  %v218_v37 = vmax.f32 %v154_v21, 0.0  ;;  %v220_v42 = vmax.f32 %v156_v28, 0.0  ;;  %v92_v43 = vmul.f32 %v374_v1, %v24_v29  ;;  %v93_v44 = vmul.f32 %v374_v1, %v25_v30 }
   0xa   :  { %v94_v45 = vmul.f32 %v374_v1, %v26_v31  ;;  %v158_v46 = vadd.f32 %v379_v2, %v90_v39  ;;  %v159_v47 = vadd.f32 %v379_v2, %v91_v40  ;;  %v95_v48 = vmul.f32 %v374_v1, %v27_v35 }
   0xb   :  { %v96_v49 = vmul.f32 %v374_v1, %v28_v36  ;;  %v221_v50 = vmax.f32 %v157_v34, 0.0  ;;  %v160_v51 = vadd.f32 %v379_v2, %v92_v43  ;;  %v161_v52 = vadd.f32 %v379_v2, %v93_v44 }
   0xc   :  { %v222_v56 = vmax.f32 %v158_v46, 0.0  ;;  %v162_v57 = vadd.f32 %v379_v2, %v94_v45  ;;  %v223_v60 = vmax.f32 %v159_v47, 0.0  ;;  %v163_v61 = vadd.f32 %v379_v2, %v95_v48 }
   0xd   :  { %v224_v63 = vmax.f32 %v160_v51, 0.0  ;;  %v164_v0 = vadd.f32 %v379_v2, %v96_v49  ;;  %v225_v6 = vmax.f32 %v161_v52, 0.0 }
   0xe   :  { %v226_v11 = vmax.f32 %v162_v57, 0.0  ;;  %v227_v15 = vmax.f32 %v163_v61, 0.0 }
   0xf   :  { %v228_v19 = vmax.f32 %v164_v0, 0.0 }
  0x10   :  { %v29_v41 = vld [vmem:[%s893_s0 + $0x78] sm:$0xff] }
  0x11   :  { %279 = vst [vmem:[%s896_s3 + $0x8] sm:$0xff] %v215_v26  ;;  %v97_v53 = vmul.f32 %v374_v1, %v29_v41 }
  0x12   :  { %280 = vst [vmem:[%s896_s3 + $0x10] sm:$0xff] %v216_v32 }
  0x13   :  { %281 = vst [vmem:[%s896_s3 + $0x18] sm:$0xff] %v217_v33  ;;  %v165_v7 = vadd.f32 %v379_v2, %v97_v53 }
  0x15   :  { %v229_v23 = vmax.f32 %v165_v7, 0.0 }
  0x1a   :  { %v30_v54 = vld [vmem:[%s893_s0 + $0x80] sm:$0xff]  ;;  %v31_v55 = vld [vmem:[%s893_s0 + $0x88] sm:$0xff] }
  0x1b   :  { %282 = vst [vmem:[%s896_s3 + $0x20] sm:$0xff] %v218_v37  ;;  %v98_v3 = vmul.f32 %v374_v1, %v30_v54  ;;  %v99_v4 = vmul.f32 %v374_v1, %v31_v55 }
  0x1d   :  { %v166_v12 = vadd.f32 %v379_v2, %v98_v3  ;;  %v167_v16 = vadd.f32 %v379_v2, %v99_v4 }
  0x1f   :  { %v230_v27 = vmax.f32 %v166_v12, 0.0  ;;  %v231_v31 = vmax.f32 %v167_v16, 0.0 }
  0x22   :  { %v32_v58 = vld [vmem:[%s893_s0 + $0x90] sm:$0xff]  ;;  %v33_v59 = vld [vmem:[%s893_s0 + $0x98] sm:$0xff] }
  0x23   :  { %283 = vst [vmem:[%s896_s3 + $0x28] sm:$0xff] %v219_v38  ;;  %v100_v8 = vmul.f32 %v374_v1, %v32_v58  ;;  %v101_v9 = vmul.f32 %v374_v1, %v33_v59 }
  0x25   :  { %v168_v20 = vadd.f32 %v379_v2, %v100_v8  ;;  %v169_v24 = vadd.f32 %v379_v2, %v101_v9 }
  0x27   :  { %v232_v35 = vmax.f32 %v168_v20, 0.0  ;;  %v233_v39 = vmax.f32 %v169_v24, 0.0 }
  0x2a   :  { %v34_v62 = vld [vmem:[%s893_s0 + $0xa0] sm:$0xff] }
  0x2b   :  { %284 = vst [vmem:[%s896_s3 + $0x30] sm:$0xff] %v220_v42  ;;  %v102_v13 = vmul.f32 %v374_v1, %v34_v62 }
  0x2d   :  { %v170_v28 = vadd.f32 %v379_v2, %v102_v13 }
  0x2f   :  { %v234_v43 = vmax.f32 %v170_v28, 0.0 }
  0x32   :  { %v35_v5 = vld [vmem:[%s893_s0 + $0xa8] sm:$0xff] }
  0x33   :  { %285 = vst [vmem:[%s896_s3 + $0x38] sm:$0xff] %v221_v50  ;;  %v103_v17 = vmul.f32 %v374_v1, %v35_v5 }
  0x35   :  { %v171_v32 = vadd.f32 %v379_v2, %v103_v17 }
  0x37   :  { %v235_v47 = vmax.f32 %v171_v32, 0.0 }
  0x3a   :  { %v36_v10 = vld [vmem:[%s893_s0 + $0xb0] sm:$0xff] }
  0x3b   :  { %286 = vst [vmem:[%s896_s3 + $0x40] sm:$0xff] %v222_v56  ;;  %v104_v21 = vmul.f32 %v374_v1, %v36_v10 }
  0x3d   :  { %v172_v36 = vadd.f32 %v379_v2, %v104_v21 }
  0x3f   :  { %v236_v51 = vmax.f32 %v172_v36, 0.0 }
  0x42   :  { %v37_v14 = vld [vmem:[%s893_s0 + $0xb8] sm:$0xff] }
  0x43   :  { %287 = vst [vmem:[%s896_s3 + $0x48] sm:$0xff] %v223_v60  ;;  %v105_v25 = vmul.f32 %v374_v1, %v37_v14 }
  0x45   :  { %v173_v40 = vadd.f32 %v379_v2, %v105_v25 }
  0x47   :  { %v237_v55 = vmax.f32 %v173_v40, 0.0 }
  0x4a   :  { %v38_v18 = vld [vmem:[%s893_s0 + $0xc0] sm:$0xff] }
  0x4b   :  { %288 = vst [vmem:[%s896_s3 + $0x50] sm:$0xff] %v224_v63  ;;  %v106_v29 = vmul.f32 %v374_v1, %v38_v18 }
  0x4d   :  { %v174_v44 = vadd.f32 %v379_v2, %v106_v29 }
  0x4f   :  { %v238_v59 = vmax.f32 %v174_v44, 0.0 }
  0x52   :  { %v39_v22 = vld [vmem:[%s893_s0 + $0xc8] sm:$0xff] }
  0x53   :  { %289 = vst [vmem:[%s896_s3 + $0x58] sm:$0xff] %v225_v6  ;;  %v107_v33 = vmul.f32 %v374_v1, %v39_v22 }
  0x55   :  { %v175_v48 = vadd.f32 %v379_v2, %v107_v33 }
  0x57   :  { %v239_v63 = vmax.f32 %v175_v48, 0.0 }
  0x5a   :  { %v40_v26 = vld [vmem:[%s893_s0 + $0xd0] sm:$0xff] }
  0x5b   :  { %290 = vst [vmem:[%s896_s3 + $0x60] sm:$0xff] %v226_v11  ;;  %v108_v37 = vmul.f32 %v374_v1, %v40_v26 }
  0x5d   :  { %v176_v52 = vadd.f32 %v379_v2, %v108_v37 }
  0x5f   :  { %v240_v5 = vmax.f32 %v176_v52, 0.0 }
  0x62   :  { %v41_v30 = vld [vmem:[%s893_s0 + $0xd8] sm:$0xff] }
  0x63   :  { %291 = vst [vmem:[%s896_s3 + $0x68] sm:$0xff] %v227_v15  ;;  %v109_v41 = vmul.f32 %v374_v1, %v41_v30 }
  0x65   :  { %v177_v56 = vadd.f32 %v379_v2, %v109_v41 }
  0x67   :  { %v241_v9 = vmax.f32 %v177_v56, 0.0 }
  0x6a   :  { %v42_v34 = vld [vmem:[%s893_s0 + $0xe0] sm:$0xff] }
  0x6b   :  { %292 = vst [vmem:[%s896_s3 + $0x70] sm:$0xff] %v228_v19  ;;  %v110_v45 = vmul.f32 %v374_v1, %v42_v34 }
  0x6d   :  { %v178_v60 = vadd.f32 %v379_v2, %v110_v45 }
  0x6f   :  { %v242_v13 = vmax.f32 %v178_v60, 0.0 }
  0x72   :  { %v43_v38 = vld [vmem:[%s893_s0 + $0xe8] sm:$0xff] }
  0x73   :  { %293 = vst [vmem:[%s896_s3 + $0x78] sm:$0xff] %v229_v23  ;;  %v111_v49 = vmul.f32 %v374_v1, %v43_v38 }
  0x75   :  { %v179_v0 = vadd.f32 %v379_v2, %v111_v49 }
  0x77   :  { %v243_v17 = vmax.f32 %v179_v0, 0.0 }
  0x7a   :  { %v44_v42 = vld [vmem:[%s893_s0 + $0xf0] sm:$0xff] }
  0x7b   :  { %294 = vst [vmem:[%s896_s3 + $0x80] sm:$0xff] %v230_v27  ;;  %v112_v53 = vmul.f32 %v374_v1, %v44_v42 }
  0x7d   :  { %v180_v6 = vadd.f32 %v379_v2, %v112_v53 }
  0x7f   :  { %v244_v21 = vmax.f32 %v180_v6, 0.0 }
  0x82   :  { %v45_v46 = vld [vmem:[%s893_s0 + $0xf8] sm:$0xff] }
  0x83   :  { %295 = vst [vmem:[%s896_s3 + $0x88] sm:$0xff] %v231_v31  ;;  %v113_v57 = vmul.f32 %v374_v1, %v45_v46 }
  0x85   :  { %v181_v10 = vadd.f32 %v379_v2, %v113_v57 }
  0x87   :  { %v245_v25 = vmax.f32 %v181_v10, 0.0 }
  0x8a   :  { %v46_v50 = vld [vmem:[%s893_s0 + $0x100] sm:$0xff] }
  0x8b   :  { %296 = vst [vmem:[%s896_s3 + $0x90] sm:$0xff] %v232_v35  ;;  %v114_v61 = vmul.f32 %v374_v1, %v46_v50 }
  0x8d   :  { %v182_v14 = vadd.f32 %v379_v2, %v114_v61 }
  0x8f   :  { %v246_v29 = vmax.f32 %v182_v14, 0.0 }
  0x92   :  { %v47_v54 = vld [vmem:[%s893_s0 + $0x108] sm:$0xff] }
  0x93   :  { %297 = vst [vmem:[%s896_s3 + $0x98] sm:$0xff] %v233_v39  ;;  %v115_v3 = vmul.f32 %v374_v1, %v47_v54 }
  0x95   :  { %v183_v18 = vadd.f32 %v379_v2, %v115_v3 }
  0x97   :  { %v247_v33 = vmax.f32 %v183_v18, 0.0 }
  0x9a   :  { %v48_v58 = vld [vmem:[%s893_s0 + $0x110] sm:$0xff] }
  0x9b   :  { %298 = vst [vmem:[%s896_s3 + $0xa0] sm:$0xff] %v234_v43  ;;  %v116_v7 = vmul.f32 %v374_v1, %v48_v58 }
  0x9d   :  { %v184_v22 = vadd.f32 %v379_v2, %v116_v7 }
  0x9f   :  { %v248_v37 = vmax.f32 %v184_v22, 0.0 }
  0xa2   :  { %v49_v62 = vld [vmem:[%s893_s0 + $0x118] sm:$0xff] }
  0xa3   :  { %299 = vst [vmem:[%s896_s3 + $0xa8] sm:$0xff] %v235_v47  ;;  %v117_v11 = vmul.f32 %v374_v1, %v49_v62 }
  0xa5   :  { %v185_v26 = vadd.f32 %v379_v2, %v117_v11 }
  0xa7   :  { %v249_v41 = vmax.f32 %v185_v26, 0.0 }
  0xaa   :  { %v50_v4 = vld [vmem:[%s893_s0 + $0x120] sm:$0xff] }
  0xab   :  { %300 = vst [vmem:[%s896_s3 + $0xb0] sm:$0xff] %v236_v51  ;;  %v118_v15 = vmul.f32 %v374_v1, %v50_v4 }
  0xad   :  { %v186_v30 = vadd.f32 %v379_v2, %v118_v15 }
  0xaf   :  { %v250_v45 = vmax.f32 %v186_v30, 0.0 }
  0xb2   :  { %v51_v8 = vld [vmem:[%s893_s0 + $0x128] sm:$0xff] }
  0xb3   :  { %301 = vst [vmem:[%s896_s3 + $0xb8] sm:$0xff] %v237_v55  ;;  %v119_v19 = vmul.f32 %v374_v1, %v51_v8 }
  0xb5   :  { %v187_v34 = vadd.f32 %v379_v2, %v119_v19 }
  0xb7   :  { %v251_v49 = vmax.f32 %v187_v34, 0.0 }
  0xba   :  { %v52_v12 = vld [vmem:[%s893_s0 + $0x130] sm:$0xff] }
  0xbb   :  { %302 = vst [vmem:[%s896_s3 + $0xc0] sm:$0xff] %v238_v59  ;;  %v120_v23 = vmul.f32 %v374_v1, %v52_v12 }
  0xbd   :  { %v188_v38 = vadd.f32 %v379_v2, %v120_v23 }
  0xbf   :  { %v252_v53 = vmax.f32 %v188_v38, 0.0 }
  0xc2   :  { %v53_v16 = vld [vmem:[%s893_s0 + $0x138] sm:$0xff] }
  0xc3   :  { %303 = vst [vmem:[%s896_s3 + $0xc8] sm:$0xff] %v239_v63  ;;  %v121_v27 = vmul.f32 %v374_v1, %v53_v16 }
  0xc5   :  { %v189_v42 = vadd.f32 %v379_v2, %v121_v27 }
  0xc7   :  { %v253_v57 = vmax.f32 %v189_v42, 0.0 }
  0xca   :  { %v54_v20 = vld [vmem:[%s893_s0 + $0x140] sm:$0xff] }
  0xcb   :  { %304 = vst [vmem:[%s896_s3 + $0xd0] sm:$0xff] %v240_v5  ;;  %v122_v31 = vmul.f32 %v374_v1, %v54_v20 }
  0xcd   :  { %v190_v46 = vadd.f32 %v379_v2, %v122_v31 }
  0xcf   :  { %v254_v61 = vmax.f32 %v190_v46, 0.0 }
  0xd2   :  { %v55_v24 = vld [vmem:[%s893_s0 + $0x148] sm:$0xff] }
  0xd3   :  { %305 = vst [vmem:[%s896_s3 + $0xd8] sm:$0xff] %v241_v9  ;;  %v123_v35 = vmul.f32 %v374_v1, %v55_v24 }
  0xd5   :  { %v191_v50 = vadd.f32 %v379_v2, %v123_v35 }
  0xd7   :  { %v255_v4 = vmax.f32 %v191_v50, 0.0 }
  0xda   :  { %v56_v28 = vld [vmem:[%s893_s0 + $0x150] sm:$0xff] }
  0xdb   :  { %306 = vst [vmem:[%s896_s3 + $0xe0] sm:$0xff] %v242_v13  ;;  %v124_v39 = vmul.f32 %v374_v1, %v56_v28 }
  0xdd   :  { %v192_v54 = vadd.f32 %v379_v2, %v124_v39 }
  0xdf   :  { %v256_v8 = vmax.f32 %v192_v54, 0.0 }
  0xe2   :  { %v57_v32 = vld [vmem:[%s893_s0 + $0x158] sm:$0xff] }
  0xe3   :  { %307 = vst [vmem:[%s896_s3 + $0xe8] sm:$0xff] %v243_v17  ;;  %v125_v43 = vmul.f32 %v374_v1, %v57_v32 }
  0xe5   :  { %v193_v58 = vadd.f32 %v379_v2, %v125_v43 }
  0xe7   :  { %v257_v12 = vmax.f32 %v193_v58, 0.0 }
  0xea   :  { %v58_v36 = vld [vmem:[%s893_s0 + $0x160] sm:$0xff] }
  0xeb   :  { %308 = vst [vmem:[%s896_s3 + $0xf0] sm:$0xff] %v244_v21  ;;  %v126_v47 = vmul.f32 %v374_v1, %v58_v36 }
  0xed   :  { %v194_v62 = vadd.f32 %v379_v2, %v126_v47 }
  0xef   :  { %v258_v17 = vmax.f32 %v194_v62, 0.0 }
  0xf2   :  { %v59_v40 = vld [vmem:[%s893_s0 + $0x168] sm:$0xff] }
  0xf3   :  { %309 = vst [vmem:[%s896_s3 + $0xf8] sm:$0xff] %v245_v25  ;;  %v127_v51 = vmul.f32 %v374_v1, %v59_v40 }
  0xf5   :  { %v195_v5 = vadd.f32 %v379_v2, %v127_v51 }
  0xf7   :  { %v259_v21 = vmax.f32 %v195_v5, 0.0 }
  0xfa   :  { %v60_v44 = vld [vmem:[%s893_s0 + $0x170] sm:$0xff] }
  0xfb   :  { %310 = vst [vmem:[%s896_s3 + $0x100] sm:$0xff] %v246_v29  ;;  %v128_v55 = vmul.f32 %v374_v1, %v60_v44 }
  0xfd   :  { %v196_v9 = vadd.f32 %v379_v2, %v128_v55 }
  0xff   :  { %v260_v26 = vmax.f32 %v196_v9, 0.0 }
 0x102   :  { %v61_v48 = vld [vmem:[%s893_s0 + $0x178] sm:$0xff] }
 0x103   :  { %311 = vst [vmem:[%s896_s3 + $0x108] sm:$0xff] %v247_v33  ;;  %v129_v59 = vmul.f32 %v374_v1, %v61_v48 }
 0x105   :  { %v197_v13 = vadd.f32 %v379_v2, %v129_v59 }
 0x107   :  { %v261_v30 = vmax.f32 %v197_v13, 0.0 }
 0x10a   :  { %v62_v52 = vld [vmem:[%s893_s0 + $0x180] sm:$0xff] }
 0x10b   :  { %312 = vst [vmem:[%s896_s3 + $0x110] sm:$0xff] %v248_v37  ;;  %v130_v63 = vmul.f32 %v374_v1, %v62_v52 }
 0x10d   :  { %v198_v18 = vadd.f32 %v379_v2, %v130_v63 }
 0x10f   :  { %v262_v34 = vmax.f32 %v198_v18, 0.0 }
 0x112   :  { %v63_v56 = vld [vmem:[%s893_s0 + $0x188] sm:$0xff] }
 0x113   :  { %313 = vst [vmem:[%s896_s3 + $0x118] sm:$0xff] %v249_v41  ;;  %v131_v6 = vmul.f32 %v374_v1, %v63_v56 }
 0x115   :  { %v199_v22 = vadd.f32 %v379_v2, %v131_v6 }
 0x117   :  { %v263_v38 = vmax.f32 %v199_v22, 0.0 }
 0x11a   :  { %v64_v60 = vld [vmem:[%s893_s0 + $0x190] sm:$0xff] }
 0x11b   :  { %314 = vst [vmem:[%s896_s3 + $0x120] sm:$0xff] %v250_v45  ;;  %v132_v10 = vmul.f32 %v374_v1, %v64_v60 }
 0x11d   :  { %v200_v27 = vadd.f32 %v379_v2, %v132_v10 }
 0x11f   :  { %v264_v42 = vmax.f32 %v200_v27, 0.0 }
 0x122   :  { %v65_v0 = vld [vmem:[%s893_s0 + $0x198] sm:$0xff] }
 0x123   :  { %v77_v3 = vld [vmem:[%s893_s0 + $0x1f8] sm:$0xff]  ;;  %v133_v14 = vmul.f32 %v374_v1, %v65_v0 }
 0x124   :  { %315 = vst [vmem:[%s896_s3 + $0x128] sm:$0xff] %v251_v49  ;;  %v145_v16 = vmul.f32 %v374_v1, %v77_v3 }
 0x125   :  { %v201_v31 = vadd.f32 %v379_v2, %v133_v14 }
 0x126   :  { %v784_v25 = vadd.f32 %v379_v2, %v145_v16 }
 0x127   :  { %v265_v46 = vmax.f32 %v201_v31, 0.0 }
 0x12b   :  { %v66_v7 = vld [vmem:[%s893_s0 + $0x1a0] sm:$0xff] }
 0x12c   :  { %316 = vst [vmem:[%s896_s3 + $0x130] sm:$0xff] %v252_v53  ;;  %v134_v19 = vmul.f32 %v374_v1, %v66_v7  ;;  %v277_v7 = vmax.f32 %v784_v25, 0.0 }
 0x12e   :  { %v202_v35 = vadd.f32 %v379_v2, %v134_v19 }
 0x130   :  { %v266_v50 = vmax.f32 %v202_v35, 0.0 }
 0x133   :  { %v67_v11 = vld [vmem:[%s893_s0 + $0x1a8] sm:$0xff] }
 0x134   :  { %317 = vst [vmem:[%s896_s3 + $0x138] sm:$0xff] %v253_v57  ;;  %v135_v23 = vmul.f32 %v374_v1, %v67_v11 }
 0x136   :  { %v203_v39 = vadd.f32 %v379_v2, %v135_v23 }
 0x138   :  { %v267_v53 = vmax.f32 %v203_v39, 0.0 }
 0x13b   :  { %v68_v15 = vld [vmem:[%s893_s0 + $0x1b0] sm:$0xff] }
 0x13c   :  { %318 = vst [vmem:[%s896_s3 + $0x140] sm:$0xff] %v254_v61  ;;  %v136_v28 = vmul.f32 %v374_v1, %v68_v15 }
 0x13e   :  { %v204_v43 = vadd.f32 %v379_v2, %v136_v28 }
 0x140   :  { %v268_v56 = vmax.f32 %v204_v43, 0.0 }
 0x143   :  { %v69_v20 = vld [vmem:[%s893_s0 + $0x1b8] sm:$0xff] }
 0x144   :  { %319 = vst [vmem:[%s896_s3 + $0x148] sm:$0xff] %v255_v4  ;;  %v137_v32 = vmul.f32 %v374_v1, %v69_v20 }
 0x146   :  { %v205_v47 = vadd.f32 %v379_v2, %v137_v32 }
 0x148   :  { %v269_v59 = vmax.f32 %v205_v47, 0.0 }
 0x14b   :  { %v70_v24 = vld [vmem:[%s893_s0 + $0x1c0] sm:$0xff] }
 0x14c   :  { %320 = vst [vmem:[%s896_s3 + $0x150] sm:$0xff] %v256_v8  ;;  %v138_v36 = vmul.f32 %v374_v1, %v70_v24 }
 0x14e   :  { %v206_v51 = vadd.f32 %v379_v2, %v138_v36 }
 0x150   :  { %v270_v61 = vmax.f32 %v206_v51, 0.0 }
 0x153   :  { %v71_v29 = vld [vmem:[%s893_s0 + $0x1c8] sm:$0xff] }
 0x154   :  { %321 = vst [vmem:[%s896_s3 + $0x158] sm:$0xff] %v257_v12  ;;  %v139_v40 = vmul.f32 %v374_v1, %v71_v29 }
 0x156   :  { %v207_v54 = vadd.f32 %v379_v2, %v139_v40 }
 0x158   :  { %v271_v63 = vmax.f32 %v207_v54, 0.0 }
 0x15b   :  { %v72_v33 = vld [vmem:[%s893_s0 + $0x1d0] sm:$0xff] }
 0x15c   :  { %322 = vst [vmem:[%s896_s3 + $0x160] sm:$0xff] %v258_v17  ;;  %v140_v44 = vmul.f32 %v374_v1, %v72_v33 }
 0x15e   :  { %v208_v57 = vadd.f32 %v379_v2, %v140_v44 }
 0x160   :  { %v272_v0 = vmax.f32 %v208_v57, 0.0 }
 0x163   :  { %v73_v37 = vld [vmem:[%s893_s0 + $0x1d8] sm:$0xff] }
 0x164   :  { %323 = vst [vmem:[%s896_s3 + $0x168] sm:$0xff] %v259_v21  ;;  %v141_v48 = vmul.f32 %v374_v1, %v73_v37 }
 0x166   :  { %v209_v60 = vadd.f32 %v379_v2, %v141_v48 }
 0x168   :  { %v273_v4 = vmax.f32 %v209_v60, 0.0 }
 0x16b   :  { %v74_v41 = vld [vmem:[%s893_s0 + $0x1e0] sm:$0xff] }
 0x16c   :  { %324 = vst [vmem:[%s896_s3 + $0x170] sm:$0xff] %v260_v26  ;;  %v142_v52 = vmul.f32 %v374_v1, %v74_v41 }
 0x16e   :  { %v210_v62 = vadd.f32 %v379_v2, %v142_v52 }
 0x170   :  { %v274_v5 = vmax.f32 %v210_v62, 0.0 }
 0x173   :  { %v75_v45 = vld [vmem:[%s893_s0 + $0x1e8] sm:$0xff] }
 0x174   :  { %325 = vst [vmem:[%s896_s3 + $0x178] sm:$0xff] %v261_v30  ;;  %v143_v55 = vmul.f32 %v374_v1, %v75_v45 }
 0x17b   :  { %v76_v49 = vld [vmem:[%s893_s0 + $0x1f0] sm:$0xff] }
 0x17c   :  { %326 = vst [vmem:[%s896_s3 + $0x180] sm:$0xff] %v262_v34  ;;  %v144_v58 = vmul.f32 %v374_v1, %v76_v49  ;;  %v211_v1 = vadd.f32 %v379_v2, %v143_v55 }
 0x17d   :  { %327 = vst [vmem:[%s896_s3 + $0x188] sm:$0xff] %v263_v38 }
 0x17e   :  { %328 = vst [vmem:[%s896_s3 + $0x190] sm:$0xff] %v264_v42  ;;  %v212_v3 = vadd.f32 %v379_v2, %v144_v58  ;;  %v275_v6 = vmax.f32 %v211_v1, 0.0 }
 0x17f   :  { %329 = vst [vmem:[%s896_s3 + $0x198] sm:$0xff] %v265_v46 }
 0x180   :  { %330 = vst [vmem:[%s896_s3 + $0x1a0] sm:$0xff] %v266_v50  ;;  %v276_v2 = vmax.f32 %v212_v3, 0.0 }
 0x181   :  { %331 = vst [vmem:[%s896_s3 + $0x1a8] sm:$0xff] %v267_v53 }
 0x182   :  { %332 = vst [vmem:[%s896_s3 + $0x1b0] sm:$0xff] %v268_v56 }
 0x183   :  { %333 = vst [vmem:[%s896_s3 + $0x1b8] sm:$0xff] %v269_v59 }
 0x184   :  { %334 = vst [vmem:[%s896_s3 + $0x1c0] sm:$0xff] %v270_v61 }
 0x185   :  { %335 = vst [vmem:[%s896_s3 + $0x1c8] sm:$0xff] %v271_v63 }
 0x186   :  { %336 = vst [vmem:[%s896_s3 + $0x1d0] sm:$0xff] %v272_v0 }
 0x187   :  { %337 = vst [vmem:[%s896_s3 + $0x1d8] sm:$0xff] %v273_v4 }
 0x188   :  { %338 = vst [vmem:[%s896_s3 + $0x1e0] sm:$0xff] %v274_v5 }
 0x189   :  { %339 = vst [vmem:[%s896_s3 + $0x1e8] sm:$0xff] %v275_v6 }
 0x18a   :  { %340 = vst [vmem:[%s896_s3 + $0x1f0] sm:$0xff] %v276_v2 }
 0x18b   :  { %341 = vst [vmem:[%s896_s3 + $0x1f8] sm:$0xff] %v277_v7 }

// kernel: conv_layer_forward.2
= control target key start
LH: loop header
LB: loop body
LE: loop exit
PB: predicated region body
PF: predicated region fallthrough
CT: control target
= control target key end

     0   :  { %s1887_s1 = inlined_call_operand.vmem [shape: f32[128,128], index: 1, kind: input, shape index: {}]   ;;  %s1888_s2 = inlined_call_operand.vmem [shape: f32[1,128], index: 2, kind: input, shape index: {}]   ;;  %s1889_s0 = inlined_call_operand.vmem [shape: f32[512,128], index: 0, kind: input, shape index: {}]   ;;  %s1890_s3 = inlined_call_operand.vmem [shape: f32[512,128], index: 3, kind: output, shape index: {0}]   ;;  %s1891_s4 = inlined_call_operand.vmem [shape: f32[8,128], index: 4, kind: output, shape index: {1}]   ;;  %s1892_s5 = inlined_call_operand.vmem [shape: f32[8,128], index: 5, kind: output, shape index: {2}]  }
   0x1   :  { %v96_v0 = vld [vmem:[%s1887_s1 + $0x78] sm:$0xff]  ;;  %v95_v1 = vld [vmem:[%s1887_s1 + $0x70] sm:$0xff]  ;;  %v94_v2 = vld [vmem:[%s1887_s1 + $0x68] sm:$0xff] }
   0x2   :  { %101 = vmatpush.msra.mxu0 %v96_v0  ;;  %977 = vmatpush.msra.mxu1 %v96_v0  ;;  %v93_v3 = vld [vmem:[%s1887_s1 + $0x60] sm:$0xff]  ;;  %v92_v4 = vld [vmem:[%s1887_s1 + $0x58] sm:$0xff]  ;;  %v91_v5 = vld [vmem:[%s1887_s1 + $0x50] sm:$0xff] }
   0x3   :  { %978 = vmatpush.msra.mxu2 %v96_v0  ;;  %979 = vmatpush.msra.mxu3 %v96_v0  ;;  %v90_v6 = vld [vmem:[%s1887_s1 + $0x48] sm:$0xff]  ;;  %v89_v7 = vld [vmem:[%s1887_s1 + $0x40] sm:$0xff]  ;;  %v88_v8 = vld [vmem:[%s1887_s1 + $0x38] sm:$0xff] }
   0x4   :  { %102 = vmatpush.msra.mxu0 %v95_v1  ;;  %980 = vmatpush.msra.mxu1 %v95_v1  ;;  %v87_v9 = vld [vmem:[%s1887_s1 + $0x30] sm:$0xff]  ;;  %v86_v10 = vld [vmem:[%s1887_s1 + $0x28] sm:$0xff]  ;;  %v85_v11 = vld [vmem:[%s1887_s1 + $0x20] sm:$0xff] }
   0x5   :  { %981 = vmatpush.msra.mxu2 %v95_v1  ;;  %982 = vmatpush.msra.mxu3 %v95_v1  ;;  %v84_v12 = vld [vmem:[%s1887_s1 + $0x18] sm:$0xff]  ;;  %v83_v13 = vld [vmem:[%s1887_s1 + $0x10] sm:$0xff]  ;;  %v82_v14 = vld [vmem:[%s1887_s1 + $0x8] sm:$0xff] }
   0x6   :  { %103 = vmatpush.msra.mxu0 %v94_v2  ;;  %983 = vmatpush.msra.mxu1 %v94_v2  ;;  %v81_v15 = vld [vmem:[%s1887_s1] sm:$0xff]  ;;  %v18_v18 = vld [vmem:[%s1889_s0 + $0x8] sm:$0xff]  ;;  %v19_v20 = vld [vmem:[%s1889_s0 + $0x10] sm:$0xff] }
   0x7   :  { %984 = vmatpush.msra.mxu2 %v94_v2  ;;  %985 = vmatpush.msra.mxu3 %v94_v2  ;;  %v17_v16 = vld [vmem:[%s1889_s0] sm:$0xff]  ;;  %v34_v19 = vld [vmem:[%s1889_s0 + $0x88] sm:$0xff]  ;;  %v35_v21 = vld [vmem:[%s1889_s0 + $0x90] sm:$0xff] }
   0x8   :  { %104 = vmatpush.msra.mxu0 %v93_v3  ;;  %986 = vmatpush.msra.mxu1 %v93_v3  ;;  %v33_v17 = vld [vmem:[%s1889_s0 + $0x80] sm:$0xff]  ;;  %v20_v22 = vld [vmem:[%s1889_s0 + $0x18] sm:$0xff]  ;;  %v50_v27 = vld [vmem:[%s1889_s0 + $0x108] sm:$0xff] }
   0x9   :  { %987 = vmatpush.msra.mxu2 %v93_v3  ;;  %988 = vmatpush.msra.mxu3 %v93_v3  ;;  %v36_v23 = vld [vmem:[%s1889_s0 + $0x98] sm:$0xff]  ;;  %v49_v24 = vld [vmem:[%s1889_s0 + $0x100] sm:$0xff]  ;;  %v22_v28 = vld [vmem:[%s1889_s0 + $0x28] sm:$0xff] }
   0xa   :  { %105 = vmatpush.msra.mxu0 %v92_v4  ;;  %989 = vmatpush.msra.mxu1 %v92_v4  ;;  %v21_v25 = vld [vmem:[%s1889_s0 + $0x20] sm:$0xff]  ;;  %v38_v29 = vld [vmem:[%s1889_s0 + $0xa8] sm:$0xff]  ;;  %v51_v30 = vld [vmem:[%s1889_s0 + $0x110] sm:$0xff] }
   0xb   :  { %990 = vmatpush.msra.mxu2 %v92_v4  ;;  %991 = vmatpush.msra.mxu3 %v92_v4  ;;  %v37_v26 = vld [vmem:[%s1889_s0 + $0xa0] sm:$0xff]  ;;  %v23_v31 = vld [vmem:[%s1889_s0 + $0x30] sm:$0xff]  ;;  %v52_v33 = vld [vmem:[%s1889_s0 + $0x118] sm:$0xff] }
   0xc   :  { %106 = vmatpush.msra.mxu0 %v91_v5  ;;  %992 = vmatpush.msra.mxu1 %v91_v5  ;;  %v39_v32 = vld [vmem:[%s1889_s0 + $0xb0] sm:$0xff]  ;;  %v24_v34 = vld [vmem:[%s1889_s0 + $0x38] sm:$0xff]  ;;  %v53_v36 = vld [vmem:[%s1889_s0 + $0x120] sm:$0xff] }
   0xd   :  { %993 = vmatpush.msra.mxu2 %v91_v5  ;;  %994 = vmatpush.msra.mxu3 %v91_v5  ;;  %v40_v35 = vld [vmem:[%s1889_s0 + $0xb8] sm:$0xff]  ;;  %v65_v37 = vld [vmem:[%s1889_s0 + $0x180] sm:$0xff]  ;;  %v54_v40 = vld [vmem:[%s1889_s0 + $0x128] sm:$0xff] }
   0xe   :  { %107 = vmatpush.msra.mxu0 %v90_v6  ;;  %995 = vmatpush.msra.mxu1 %v90_v6  ;;  %v25_v38 = vld [vmem:[%s1889_s0 + $0x40] sm:$0xff]  ;;  %v66_v41 = vld [vmem:[%s1889_s0 + $0x188] sm:$0xff]  ;;  %v55_v44 = vld [vmem:[%s1889_s0 + $0x130] sm:$0xff] }
   0xf   :  { %996 = vmatpush.msra.mxu2 %v90_v6  ;;  %997 = vmatpush.msra.mxu3 %v90_v6  ;;  %v41_v39 = vld [vmem:[%s1889_s0 + $0xc0] sm:$0xff]  ;;  %v26_v42 = vld [vmem:[%s1889_s0 + $0x48] sm:$0xff]  ;;  %v67_v45 = vld [vmem:[%s1889_s0 + $0x190] sm:$0xff] }
  0x10   :  { %108 = vmatpush.msra.mxu0 %v89_v7  ;;  %998 = vmatpush.msra.mxu1 %v89_v7  ;;  %v42_v43 = vld [vmem:[%s1889_s0 + $0xc8] sm:$0xff]  ;;  %v27_v46 = vld [vmem:[%s1889_s0 + $0x50] sm:$0xff]  ;;  %v56_v48 = vld [vmem:[%s1889_s0 + $0x138] sm:$0xff] }
  0x11   :  { %999 = vmatpush.msra.mxu2 %v89_v7  ;;  %1000 = vmatpush.msra.mxu3 %v89_v7  ;;  %v43_v47 = vld [vmem:[%s1889_s0 + $0xd0] sm:$0xff]  ;;  %v68_v49 = vld [vmem:[%s1889_s0 + $0x198] sm:$0xff]  ;;  %v57_v52 = vld [vmem:[%s1889_s0 + $0x140] sm:$0xff] }
  0x12   :  { %109 = vmatpush.msra.mxu0 %v88_v8  ;;  %1001 = vmatpush.msra.mxu1 %v88_v8  ;;  %v28_v50 = vld [vmem:[%s1889_s0 + $0x58] sm:$0xff]  ;;  %v69_v53 = vld [vmem:[%s1889_s0 + $0x1a0] sm:$0xff]  ;;  %v58_v56 = vld [vmem:[%s1889_s0 + $0x148] sm:$0xff] }
  0x13   :  { %1002 = vmatpush.msra.mxu2 %v88_v8  ;;  %1003 = vmatpush.msra.mxu3 %v88_v8  ;;  %v44_v51 = vld [vmem:[%s1889_s0 + $0xd8] sm:$0xff]  ;;  %v29_v54 = vld [vmem:[%s1889_s0 + $0x60] sm:$0xff]  ;;  %v70_v57 = vld [vmem:[%s1889_s0 + $0x1a8] sm:$0xff] }
  0x14   :  { %110 = vmatpush.msra.mxu0 %v87_v9  ;;  %1004 = vmatpush.msra.mxu1 %v87_v9  ;;  %v45_v55 = vld [vmem:[%s1889_s0 + $0xe0] sm:$0xff]  ;;  %v30_v58 = vld [vmem:[%s1889_s0 + $0x68] sm:$0xff]  ;;  %v59_v60 = vld [vmem:[%s1889_s0 + $0x150] sm:$0xff] }
  0x15   :  { %1005 = vmatpush.msra.mxu2 %v87_v9  ;;  %1006 = vmatpush.msra.mxu3 %v87_v9  ;;  %v46_v59 = vld [vmem:[%s1889_s0 + $0xe8] sm:$0xff]  ;;  %v71_v61 = vld [vmem:[%s1889_s0 + $0x1b0] sm:$0xff]  ;;  %v60_v0 = vld [vmem:[%s1889_s0 + $0x158] sm:$0xff] }
  0x16   :  { %111 = vmatpush.msra.mxu0 %v86_v10  ;;  %1007 = vmatpush.msra.mxu1 %v86_v10  ;;  %v31_v62 = vld [vmem:[%s1889_s0 + $0x70] sm:$0xff]  ;;  %v72_v1 = vld [vmem:[%s1889_s0 + $0x1b8] sm:$0xff]  ;;  %v61_v4 = vld [vmem:[%s1889_s0 + $0x160] sm:$0xff] }
  0x17   :  { %1008 = vmatpush.msra.mxu2 %v86_v10  ;;  %1009 = vmatpush.msra.mxu3 %v86_v10  ;;  %v47_v63 = vld [vmem:[%s1889_s0 + $0xf0] sm:$0xff]  ;;  %v32_v2 = vld [vmem:[%s1889_s0 + $0x78] sm:$0xff]  ;;  %v73_v5 = vld [vmem:[%s1889_s0 + $0x1c0] sm:$0xff] }
  0x18   :  { %112 = vmatpush.msra.mxu0 %v85_v11  ;;  %1010 = vmatpush.msra.mxu1 %v85_v11  ;;  %v48_v3 = vld [vmem:[%s1889_s0 + $0xf8] sm:$0xff]  ;;  %v1269_v6 = vld [vmem:[%s1888_s2] ss:$0 sm:$0xff] }
  0x19   :  { %1011 = vmatpush.msra.mxu2 %v85_v11  ;;  %1012 = vmatpush.msra.mxu3 %v85_v11  ;;  %v62_v11 = vld [vmem:[%s1889_s0 + $0x168] sm:$0xff] }
  0x1a   :  { %113 = vmatpush.msra.mxu0 %v84_v12  ;;  %1013 = vmatpush.msra.mxu1 %v84_v12 }
  0x1b   :  { %1014 = vmatpush.msra.mxu2 %v84_v12  ;;  %1015 = vmatpush.msra.mxu3 %v84_v12  ;;  %v74_v12 = vld [vmem:[%s1889_s0 + $0x1c8] sm:$0xff] }
  0x1c   :  { %114 = vmatpush.msra.mxu0 %v83_v13  ;;  %1016 = vmatpush.msra.mxu1 %v83_v13 }
  0x1d   :  { %1017 = vmatpush.msra.mxu2 %v83_v13  ;;  %1018 = vmatpush.msra.mxu3 %v83_v13 }
  0x1e   :  { %115 = vmatpush.msra.mxu0 %v82_v14  ;;  %1019 = vmatpush.msra.mxu1 %v82_v14 }
  0x1f   :  { %1020 = vmatpush.msra.mxu2 %v82_v14  ;;  %1021 = vmatpush.msra.mxu3 %v82_v14 }
  0x20   :  { %116 = vmatpush.msra.mxu0 %v81_v15  ;;  %1022 = vmatpush.msra.mxu1 %v81_v15 }
  0x21   :  { %117 = vmatmul.f32.vlgmr.msra.gmra.mxu0 %v17_v16  ;;  %165 = vmatmul.f32.vlgmr.msra.gmra.mxu1 %v33_v17 }
  0x22   :  { %1023 = vmatpush.msra.mxu2 %v81_v15  ;;  %1024 = vmatpush.msra.mxu3 %v81_v15 }
  0x23   :  { %213 = vmatmul.f32.vlgmr.msra.gmra.mxu2 %v49_v24  ;;  %261 = vmatmul.f32.vlgmr.msra.gmra.mxu3 %v65_v37 }
  0x29   :  { %120 = vmatmul.f32.gmra.mxu0 %v18_v18  ;;  %168 = vmatmul.f32.gmra.mxu1 %v34_v19 }
  0x2b   :  { %216 = vmatmul.f32.gmra.mxu2 %v50_v27  ;;  %264 = vmatmul.f32.gmra.mxu3 %v66_v41 }
  0x31   :  { %123 = vmatmul.f32.gmra.mxu0 %v19_v20  ;;  %171 = vmatmul.f32.gmra.mxu1 %v35_v21  ;;  %v63_v20 = vld [vmem:[%s1889_s0 + $0x170] sm:$0xff] }
  0x32   :  { %v75_v21 = vld [vmem:[%s1889_s0 + $0x1d0] sm:$0xff] }
  0x33   :  { %219 = vmatmul.f32.gmra.mxu2 %v51_v30  ;;  %267 = vmatmul.f32.gmra.mxu3 %v67_v45  ;;  %v76_v30 = vld [vmem:[%s1889_s0 + $0x1d8] sm:$0xff] }
  0x39   :  { %126 = vmatmul.f32.gmra.mxu0 %v20_v22  ;;  %174 = vmatmul.f32.gmra.mxu1 %v36_v23 }
  0x3b   :  { %222 = vmatmul.f32.gmra.mxu2 %v52_v33  ;;  %270 = vmatmul.f32.gmra.mxu3 %v68_v49 }
  0x41   :  { %129 = vmatmul.f32.gmra.mxu0 %v21_v25  ;;  %177 = vmatmul.f32.gmra.mxu1 %v37_v26 }
  0x43   :  { %225 = vmatmul.f32.gmra.mxu2 %v53_v36  ;;  %273 = vmatmul.f32.gmra.mxu3 %v69_v53 }
  0x49   :  { %132 = vmatmul.f32.gmra.mxu0 %v22_v28  ;;  %180 = vmatmul.f32.gmra.mxu1 %v38_v29  ;;  %v64_v29 = vld [vmem:[%s1889_s0 + $0x178] sm:$0xff] }
  0x4b   :  { %228 = vmatmul.f32.gmra.mxu2 %v54_v40  ;;  %276 = vmatmul.f32.gmra.mxu3 %v70_v57 }
  0x51   :  { %135 = vmatmul.f32.gmra.mxu0 %v23_v31  ;;  %183 = vmatmul.f32.gmra.mxu1 %v39_v32 }
  0x53   :  { %231 = vmatmul.f32.gmra.mxu2 %v55_v44  ;;  %279 = vmatmul.f32.gmra.mxu3 %v71_v61 }
  0x59   :  { %138 = vmatmul.f32.gmra.mxu0 %v24_v34  ;;  %186 = vmatmul.f32.gmra.mxu1 %v40_v35 }
  0x5b   :  { %234 = vmatmul.f32.gmra.mxu2 %v56_v48  ;;  %282 = vmatmul.f32.gmra.mxu3 %v72_v1  ;;  %v78_v48 = vld [vmem:[%s1889_s0 + $0x1e8] sm:$0xff] }
  0x61   :  { %141 = vmatmul.f32.gmra.mxu0 %v25_v38  ;;  %189 = vmatmul.f32.gmra.mxu1 %v41_v39  ;;  %v77_v38 = vld [vmem:[%s1889_s0 + $0x1e0] sm:$0xff] }
  0x63   :  { %237 = vmatmul.f32.gmra.mxu2 %v57_v52  ;;  %285 = vmatmul.f32.gmra.mxu3 %v73_v5 }
  0x69   :  { %144 = vmatmul.f32.gmra.mxu0 %v26_v42  ;;  %192 = vmatmul.f32.gmra.mxu1 %v42_v43 }
  0x6b   :  { %240 = vmatmul.f32.gmra.mxu2 %v58_v56  ;;  %288 = vmatmul.f32.gmra.mxu3 %v74_v12  ;;  %v79_v56 = vld [vmem:[%s1889_s0 + $0x1f0] sm:$0xff] }
  0x71   :  { %147 = vmatmul.f32.gmra.mxu0 %v27_v46  ;;  %195 = vmatmul.f32.gmra.mxu1 %v43_v47 }
  0x73   :  { %243 = vmatmul.f32.gmra.mxu2 %v59_v60  ;;  %291 = vmatmul.f32.gmra.mxu3 %v75_v21 }
  0x79   :  { %150 = vmatmul.f32.gmra.mxu0 %v28_v50  ;;  %198 = vmatmul.f32.gmra.mxu1 %v44_v51 }
  0x7b   :  { %246 = vmatmul.f32.gmra.mxu2 %v60_v0  ;;  %294 = vmatmul.f32.gmra.mxu3 %v76_v30 }
  0x81   :  { %153 = vmatmul.f32.gmra.mxu0 %v29_v54  ;;  %201 = vmatmul.f32.gmra.mxu1 %v45_v55 }
  0x83   :  { %249 = vmatmul.f32.gmra.mxu2 %v61_v4  ;;  %297 = vmatmul.f32.gmra.mxu3 %v77_v38 }
  0x89   :  { %156 = vmatmul.f32.gmra.mxu0 %v30_v58  ;;  %204 = vmatmul.f32.gmra.mxu1 %v46_v59 }
  0x8b   :  { %252 = vmatmul.f32.gmra.mxu2 %v62_v11  ;;  %300 = vmatmul.f32.gmra.mxu3 %v78_v48 }
  0x91   :  { %159 = vmatmul.f32.gmra.mxu0 %v31_v62  ;;  %207 = vmatmul.f32.gmra.mxu1 %v47_v63  ;;  %v80_v63 = vld [vmem:[%s1889_s0 + $0x1f8] sm:$0xff] }
  0x93   :  { %255 = vmatmul.f32.gmra.mxu2 %v63_v20  ;;  %303 = vmatmul.f32.gmra.mxu3 %v79_v56 }
  0x99   :  { %162 = vmatmul.f32.gmra.mxu0 %v32_v2  ;;  %210 = vmatmul.f32.gmra.mxu1 %v48_v3 }
  0x9b   :  { %258 = vmatmul.f32.gmra.mxu2 %v64_v29  ;;  %306 = vmatmul.f32.gmra.mxu3 %v80_v63 }
  0x9e   :  { %v118_v7 = vpop.f32.mrf.mxu0  ;;  %v166_v8 = vpop.f32.mrf.mxu1 }
  0x9f   :  { %v119_v9 = vadd.f32 %v1269_v6, %v118_v7  ;;  %v1273_v10 = vadd.f32 %v1269_v6, %v166_v8 }
  0xa1   :  { %310 = vst [vmem:[%s1890_s3] sm:$0xff] %v119_v9  ;;  %v830_v17 = vmul.f32 %v119_v9, %v119_v9 }
  0xa2   :  { %326 = vst [vmem:[%s1890_s3 + $0x80] sm:$0xff] %v1273_v10 }
  0xa6   :  { %v121_v13 = vpop.f32.mrf.mxu0  ;;  %v169_v14 = vpop.f32.mrf.mxu1 }
  0xa7   :  { %v122_v15 = vadd.f32 %v1269_v6, %v121_v13  ;;  %v1290_v16 = vadd.f32 %v1269_v6, %v169_v14  ;;  %v214_v44 = vpop.f32.mrf.mxu2  ;;  %v262_v13 = vpop.f32.mrf.mxu3 }
  0xa8   :  { %v1341_v45 = vadd.f32 %v1269_v6, %v214_v44 }
  0xa9   :  { %311 = vst [vmem:[%s1890_s3 + $0x8] sm:$0xff] %v122_v15  ;;  %v761_v18 = vadd.f32 %v122_v15, %v119_v9  ;;  %v831_v19 = vmul.f32 %v122_v15, %v122_v15  ;;  %v1440_v15 = vadd.f32 %v1269_v6, %v262_v13 }
  0xaa   :  { %327 = vst [vmem:[%s1890_s3 + $0x88] sm:$0xff] %v1290_v16 }
  0xab   :  { %v894_v22 = vadd.f32 %v831_v19, %v830_v17  ;;  %342 = vst [vmem:[%s1890_s3 + $0x100] sm:$0xff] %v1341_v45 }
  0xac   :  { %358 = vst [vmem:[%s1890_s3 + $0x180] sm:$0xff] %v1440_v15 }
  0xae   :  { %v124_v23 = vpop.f32.mrf.mxu0  ;;  %v172_v24 = vpop.f32.mrf.mxu1 }
  0xaf   :  { %v125_v25 = vadd.f32 %v1269_v6, %v124_v23  ;;  %v1307_v26 = vadd.f32 %v1269_v6, %v172_v24  ;;  %v217_v54 = vpop.f32.mrf.mxu2 }
  0xb0   :  { %v1368_v55 = vadd.f32 %v1269_v6, %v217_v54 }
  0xb1   :  { %312 = vst [vmem:[%s1890_s3 + $0x10] sm:$0xff] %v125_v25  ;;  %v762_v27 = vadd.f32 %v761_v18, %v125_v25  ;;  %v832_v28 = vmul.f32 %v125_v25, %v125_v25 }
  0xb2   :  { %328 = vst [vmem:[%s1890_s3 + $0x90] sm:$0xff] %v1307_v26 }
  0xb3   :  { %v895_v31 = vadd.f32 %v894_v22, %v832_v28  ;;  %343 = vst [vmem:[%s1890_s3 + $0x108] sm:$0xff] %v1368_v55  ;;  %v265_v22 = vpop.f32.mrf.mxu3 }
  0xb4   :  { %v1468_v24 = vadd.f32 %v1269_v6, %v265_v22 }
  0xb6   :  { %v127_v32 = vpop.f32.mrf.mxu0  ;;  %v175_v33 = vpop.f32.mrf.mxu1  ;;  %359 = vst [vmem:[%s1890_s3 + $0x188] sm:$0xff] %v1468_v24 }
  0xb7   :  { %v128_v34 = vadd.f32 %v1269_v6, %v127_v32  ;;  %v1324_v35 = vadd.f32 %v1269_v6, %v175_v33  ;;  %v220_v61 = vpop.f32.mrf.mxu2 }
  0xb8   :  { %v1392_v62 = vadd.f32 %v1269_v6, %v220_v61 }
  0xb9   :  { %313 = vst [vmem:[%s1890_s3 + $0x18] sm:$0xff] %v128_v34  ;;  %v763_v36 = vadd.f32 %v762_v27, %v128_v34  ;;  %v833_v37 = vmul.f32 %v128_v34, %v128_v34 }
  0xba   :  { %329 = vst [vmem:[%s1890_s3 + $0x98] sm:$0xff] %v1324_v35 }
  0xbb   :  { %v896_v39 = vadd.f32 %v895_v31, %v833_v37  ;;  %344 = vst [vmem:[%s1890_s3 + $0x110] sm:$0xff] %v1392_v62  ;;  %v268_v31 = vpop.f32.mrf.mxu3 }
  0xbc   :  { %v1496_v33 = vadd.f32 %v1269_v6, %v268_v31 }
  0xbe   :  { %v130_v40 = vpop.f32.mrf.mxu0  ;;  %v178_v41 = vpop.f32.mrf.mxu1  ;;  %360 = vst [vmem:[%s1890_s3 + $0x190] sm:$0xff] %v1496_v33 }
  0xbf   :  { %v131_v42 = vadd.f32 %v1269_v6, %v130_v40  ;;  %v1338_v43 = vadd.f32 %v1269_v6, %v178_v41  ;;  %v223_v4 = vpop.f32.mrf.mxu2 }
  0xc0   :  { %v1416_v5 = vadd.f32 %v1269_v6, %v223_v4 }
  0xc1   :  { %314 = vst [vmem:[%s1890_s3 + $0x20] sm:$0xff] %v131_v42  ;;  %v1346_v46 = vadd.f32 %v763_v36, %v131_v42  ;;  %v834_v47 = vmul.f32 %v131_v42, %v131_v42 }
  0xc2   :  { %330 = vst [vmem:[%s1890_s3 + $0xa0] sm:$0xff] %v1338_v43 }
  0xc3   :  { %v1355_v49 = vadd.f32 %v896_v39, %v834_v47  ;;  %345 = vst [vmem:[%s1890_s3 + $0x118] sm:$0xff] %v1416_v5  ;;  %v271_v40 = vpop.f32.mrf.mxu3 }
  0xc4   :  { %v1522_v42 = vadd.f32 %v1269_v6, %v271_v40 }
  0xc6   :  { %v133_v50 = vpop.f32.mrf.mxu0  ;;  %v181_v51 = vpop.f32.mrf.mxu1  ;;  %361 = vst [vmem:[%s1890_s3 + $0x198] sm:$0xff] %v1522_v42 }
  0xc7   :  { %v1362_v52 = vadd.f32 %v1269_v6, %v133_v50  ;;  %v1365_v53 = vadd.f32 %v1269_v6, %v181_v51  ;;  %v226_v12 = vpop.f32.mrf.mxu2 }
  0xc8   :  { %v1437_v14 = vadd.f32 %v1269_v6, %v226_v12 }
  0xc9   :  { %315 = vst [vmem:[%s1890_s3 + $0x28] sm:$0xff] %v1362_v52  ;;  %v765_v63 = vadd.f32 %v1346_v46, %v1362_v52 }
  0xca   :  { %331 = vst [vmem:[%s1890_s3 + $0xa8] sm:$0xff] %v1365_v53 }
  0xcb   :  { %346 = vst [vmem:[%s1890_s3 + $0x120] sm:$0xff] %v1437_v14  ;;  %v274_v54 = vpop.f32.mrf.mxu3 }
  0xce   :  { %v136_v57 = vpop.f32.mrf.mxu0  ;;  %v184_v58 = vpop.f32.mrf.mxu1 }
  0xcf   :  { %v1386_v59 = vadd.f32 %v1269_v6, %v136_v57  ;;  %v1389_v60 = vadd.f32 %v1269_v6, %v184_v58  ;;  %v229_v21 = vpop.f32.mrf.mxu2  ;;  %v1547_v57 = vadd.f32 %v1269_v6, %v274_v54  ;;  %v835_v58 = vmul.f32 %v1362_v52, %v1362_v52 }
  0xd0   :  { %v1465_v23 = vadd.f32 %v1269_v6, %v229_v21 }
  0xd1   :  { %316 = vst [vmem:[%s1890_s3 + $0x30] sm:$0xff] %v1386_v59  ;;  %v836_v61 = vmul.f32 %v1386_v59, %v1386_v59 }
  0xd2   :  { %332 = vst [vmem:[%s1890_s3 + $0xb0] sm:$0xff] %v1389_v60 }
  0xd3   :  { %347 = vst [vmem:[%s1890_s3 + $0x128] sm:$0xff] %v1465_v23 }
  0xd4   :  { %362 = vst [vmem:[%s1890_s3 + $0x1a0] sm:$0xff] %v1547_v57 }
  0xd6   :  { %v139_v0 = vpop.f32.mrf.mxu0  ;;  %v187_v1 = vpop.f32.mrf.mxu1 }
  0xd7   :  { %v1410_v2 = vadd.f32 %v1269_v6, %v139_v0  ;;  %v1413_v3 = vadd.f32 %v1269_v6, %v187_v1  ;;  %v232_v30 = vpop.f32.mrf.mxu2  ;;  %v898_v0 = vadd.f32 %v1355_v49, %v835_v58 }
  0xd8   :  { %v1493_v32 = vadd.f32 %v1269_v6, %v232_v30 }
  0xd9   :  { %317 = vst [vmem:[%s1890_s3 + $0x38] sm:$0xff] %v1410_v2  ;;  %v837_v1 = vmul.f32 %v1410_v2, %v1410_v2  ;;  %v899_v21 = vadd.f32 %v898_v0, %v836_v61 }
  0xda   :  { %333 = vst [vmem:[%s1890_s3 + $0xb8] sm:$0xff] %v1413_v3 }
  0xdb   :  { %348 = vst [vmem:[%s1890_s3 + $0x130] sm:$0xff] %v1493_v32 }
  0xde   :  { %v142_v7 = vpop.f32.mrf.mxu0  ;;  %v190_v8 = vpop.f32.mrf.mxu1 }
  0xdf   :  { %v1431_v9 = vadd.f32 %v1269_v6, %v142_v7  ;;  %v1434_v11 = vadd.f32 %v1269_v6, %v190_v8  ;;  %v235_v39 = vpop.f32.mrf.mxu2  ;;  %v766_v8 = vadd.f32 %v765_v63, %v1386_v59  ;;  %v900_v59 = vadd.f32 %v899_v21, %v837_v1 }
  0xe0   :  { %v1519_v41 = vadd.f32 %v1269_v6, %v235_v39 }
  0xe1   :  { %318 = vst [vmem:[%s1890_s3 + $0x40] sm:$0xff] %v1431_v9  ;;  %v838_v46 = vmul.f32 %v1431_v9, %v1431_v9  ;;  %v767_v22 = vadd.f32 %v766_v8, %v1410_v2 }
  0xe2   :  { %334 = vst [vmem:[%s1890_s3 + $0xc0] sm:$0xff] %v1434_v11 }
  0xe3   :  { %349 = vst [vmem:[%s1890_s3 + $0x138] sm:$0xff] %v1519_v41  ;;  %v901_v2 = vadd.f32 %v900_v59, %v838_v46 }
  0xe6   :  { %v145_v17 = vpop.f32.mrf.mxu0  ;;  %v193_v18 = vpop.f32.mrf.mxu1 }
  0xe7   :  { %v1459_v19 = vadd.f32 %v1269_v6, %v145_v17  ;;  %v1462_v20 = vadd.f32 %v1269_v6, %v193_v18  ;;  %v238_v51 = vpop.f32.mrf.mxu2  ;;  %v277_v18 = vpop.f32.mrf.mxu3 }
  0xe8   :  { %v1544_v56 = vadd.f32 %v1269_v6, %v238_v51  ;;  %v1584_v52 = vadd.f32 %v1269_v6, %v277_v18 }
  0xe9   :  { %319 = vst [vmem:[%s1890_s3 + $0x48] sm:$0xff] %v1459_v19 }
  0xea   :  { %335 = vst [vmem:[%s1890_s3 + $0xc8] sm:$0xff] %v1462_v20 }
  0xeb   :  { %350 = vst [vmem:[%s1890_s3 + $0x140] sm:$0xff] %v1544_v56 }
  0xec   :  { %363 = vst [vmem:[%s1890_s3 + $0x1a8] sm:$0xff] %v1584_v52 }
  0xee   :  { %v148_v25 = vpop.f32.mrf.mxu0  ;;  %v196_v27 = vpop.f32.mrf.mxu1 }
  0xef   :  { %v1487_v28 = vadd.f32 %v1269_v6, %v148_v25  ;;  %v1490_v29 = vadd.f32 %v1269_v6, %v196_v27  ;;  %v241_v17 = vpop.f32.mrf.mxu2  ;;  %v839_v25 = vmul.f32 %v1459_v19, %v1459_v19  ;;  %v768_v27 = vadd.f32 %v767_v22, %v1431_v9  ;;  %v280_v54 = vpop.f32.mrf.mxu3 }
  0xf0   :  { %v1581_v49 = vadd.f32 %v1269_v6, %v241_v17 }
  0xf1   :  { %320 = vst [vmem:[%s1890_s3 + $0x50] sm:$0xff] %v1487_v28  ;;  %v769_v30 = vadd.f32 %v768_v27, %v1459_v19  ;;  %v840_v31 = vmul.f32 %v1487_v28, %v1487_v28  ;;  %v1617_v19 = vadd.f32 %v1269_v6, %v280_v54 }
  0xf2   :  { %336 = vst [vmem:[%s1890_s3 + $0xd0] sm:$0xff] %v1490_v29 }
  0xf3   :  { %351 = vst [vmem:[%s1890_s3 + $0x148] sm:$0xff] %v1581_v49  ;;  %v770_v9 = vadd.f32 %v769_v30, %v1487_v28 }
  0xf4   :  { %364 = vst [vmem:[%s1890_s3 + $0x1b0] sm:$0xff] %v1617_v19 }
  0xf6   :  { %v151_v34 = vpop.f32.mrf.mxu0  ;;  %v199_v36 = vpop.f32.mrf.mxu1 }
  0xf7   :  { %v152_v37 = vadd.f32 %v1269_v6, %v151_v34  ;;  %v1516_v38 = vadd.f32 %v1269_v6, %v199_v36  ;;  %v902_v34 = vadd.f32 %v901_v2, %v839_v25  ;;  %v244_v51 = vpop.f32.mrf.mxu2  ;;  %v283_v25 = vpop.f32.mrf.mxu3 }
  0xf8   :  { %v1614_v58 = vadd.f32 %v1269_v6, %v244_v51  ;;  %v1642_v2 = vadd.f32 %v1269_v6, %v283_v25 }
  0xf9   :  { %321 = vst [vmem:[%s1890_s3 + $0x58] sm:$0xff] %v152_v37  ;;  %v841_v40 = vmul.f32 %v152_v37, %v152_v37  ;;  %v903_v61 = vadd.f32 %v902_v34, %v840_v31  ;;  %v771_v63 = vadd.f32 %v770_v9, %v152_v37  ;;  %v846_v34 = vmul.f32 %v1273_v10, %v1273_v10 }
  0xfa   :  { %337 = vst [vmem:[%s1890_s3 + $0xd8] sm:$0xff] %v1516_v38  ;;  %v847_v9 = vmul.f32 %v1290_v16, %v1290_v16 }
  0xfb   :  { %v904_v28 = vadd.f32 %v903_v61, %v841_v40  ;;  %352 = vst [vmem:[%s1890_s3 + $0x150] sm:$0xff] %v1614_v58 }
  0xfc   :  { %365 = vst [vmem:[%s1890_s3 + $0x1b8] sm:$0xff] %v1642_v2 }
  0xfe   :  { %v154_v44 = vpop.f32.mrf.mxu0  ;;  %v202_v47 = vpop.f32.mrf.mxu1 }
  0xff   :  { %v155_v48 = vadd.f32 %v1269_v6, %v154_v44  ;;  %v1541_v50 = vadd.f32 %v1269_v6, %v202_v47  ;;  %v247_v59 = vpop.f32.mrf.mxu2 }
 0x100   :  { %v1639_v27 = vadd.f32 %v1269_v6, %v247_v59 }
 0x101   :  { %322 = vst [vmem:[%s1890_s3 + $0x60] sm:$0xff] %v155_v48  ;;  %v842_v0 = vmul.f32 %v155_v48, %v155_v48  ;;  %v772_v1 = vadd.f32 %v771_v63, %v155_v48  ;;  %v286_v63 = vpop.f32.mrf.mxu3 }
 0x102   :  { %338 = vst [vmem:[%s1890_s3 + $0xe0] sm:$0xff] %v1541_v50 }
 0x103   :  { %v905_v37 = vadd.f32 %v904_v28, %v842_v0  ;;  %353 = vst [vmem:[%s1890_s3 + $0x158] sm:$0xff] %v1639_v27  ;;  %v1672_v28 = vadd.f32 %v1269_v6, %v286_v63 }
 0x105   :  { %366 = vst [vmem:[%s1890_s3 + $0x1c0] sm:$0xff] %v1672_v28 }
 0x106   :  { %v157_v4 = vpop.f32.mrf.mxu0  ;;  %v205_v7 = vpop.f32.mrf.mxu1 }
 0x107   :  { %v158_v12 = vadd.f32 %v1269_v6, %v157_v4  ;;  %v1576_v13 = vadd.f32 %v1269_v6, %v205_v7  ;;  %v250_v61 = vpop.f32.mrf.mxu2 }
 0x108   :  { %v1669_v0 = vadd.f32 %v1269_v6, %v250_v61 }
 0x109   :  { %323 = vst [vmem:[%s1890_s3 + $0x68] sm:$0xff] %v158_v12  ;;  %v843_v4 = vmul.f32 %v158_v12, %v158_v12  ;;  %v773_v7 = vadd.f32 %v772_v1, %v158_v12  ;;  %v849_v1 = vmul.f32 %v1324_v35, %v1324_v35 }
 0x10a   :  { %339 = vst [vmem:[%s1890_s3 + $0xe8] sm:$0xff] %v1576_v13 }
 0x10b   :  { %v906_v21 = vadd.f32 %v905_v37, %v843_v4  ;;  %354 = vst [vmem:[%s1890_s3 + $0x160] sm:$0xff] %v1669_v0 }
 0x10e   :  { %v160_v36 = vpop.f32.mrf.mxu0  ;;  %v208_v39 = vpop.f32.mrf.mxu1 }
 0x10f   :  { %v161_v44 = vadd.f32 %v1269_v6, %v160_v36  ;;  %v1611_v47 = vadd.f32 %v1269_v6, %v208_v39 }
 0x111   :  { %324 = vst [vmem:[%s1890_s3 + $0x70] sm:$0xff] %v161_v44  ;;  %v844_v8 = vmul.f32 %v161_v44, %v161_v44  ;;  %v774_v46 = vadd.f32 %v773_v7, %v161_v44 }
 0x112   :  { %340 = vst [vmem:[%s1890_s3 + $0xf0] sm:$0xff] %v1611_v47 }
 0x113   :  { %v907_v30 = vadd.f32 %v906_v21, %v844_v8 }
 0x116   :  { %v163_v17 = vpop.f32.mrf.mxu0  ;;  %v211_v18 = vpop.f32.mrf.mxu1 }
 0x117   :  { %v164_v48 = vadd.f32 %v1269_v6, %v163_v17  ;;  %v1636_v22 = vadd.f32 %v1269_v6, %v211_v18  ;;  %v852_v18 = vmul.f32 %v1389_v60, %v1389_v60 }
 0x119   :  { %325 = vst [vmem:[%s1890_s3 + $0x78] sm:$0xff] %v164_v48  ;;  %v775_v12 = vadd.f32 %v774_v46, %v164_v48  ;;  %v845_v31 = vmul.f32 %v164_v48, %v164_v48  ;;  %v253_v48 = vpop.f32.mrf.mxu2 }
 0x11a   :  { %341 = vst [vmem:[%s1890_s3 + $0xf8] sm:$0xff] %v1636_v22  ;;  %v1695_v59 = vadd.f32 %v1269_v6, %v253_v48 }
 0x11b   :  { %v776_v36 = vadd.f32 %v775_v12, %v1273_v10  ;;  %v908_v39 = vadd.f32 %v907_v30, %v845_v31  ;;  %v848_v10 = vmul.f32 %v1307_v26, %v1307_v26  ;;  %v853_v30 = vmul.f32 %v1413_v3, %v1413_v3 }
 0x11c   :  { %355 = vst [vmem:[%s1890_s3 + $0x168] sm:$0xff] %v1695_v59 }
 0x11d   :  { %v777_v40 = vadd.f32 %v776_v36, %v1290_v16  ;;  %v909_v44 = vadd.f32 %v908_v39, %v846_v34 }
 0x11f   :  { %v778_v51 = vadd.f32 %v777_v40, %v1307_v26  ;;  %v910_v54 = vadd.f32 %v909_v44, %v847_v9  ;;  %v850_v26 = vmul.f32 %v1338_v43, %v1338_v43  ;;  %v856_v9 = vmul.f32 %v1490_v29, %v1490_v29 }
 0x121   :  { %v779_v16 = vadd.f32 %v778_v51, %v1324_v35  ;;  %v911_v4 = vadd.f32 %v910_v54, %v848_v10  ;;  %v851_v35 = vmul.f32 %v1365_v53, %v1365_v53  ;;  %v256_v10 = vpop.f32.mrf.mxu2 }
 0x122   :  { %v1721_v51 = vadd.f32 %v1269_v6, %v256_v10 }
 0x123   :  { %v780_v37 = vadd.f32 %v779_v16, %v1338_v43  ;;  %v912_v7 = vadd.f32 %v911_v4, %v849_v1  ;;  %v289_v43 = vpop.f32.mrf.mxu3  ;;  %v858_v16 = vmul.f32 %v1541_v50, %v1541_v50 }
 0x124   :  { %v1698_v25 = vadd.f32 %v1269_v6, %v289_v43  ;;  %356 = vst [vmem:[%s1890_s3 + $0x170] sm:$0xff] %v1721_v51 }
 0x125   :  { %v913_v8 = vadd.f32 %v912_v7, %v850_v26  ;;  %v781_v17 = vadd.f32 %v780_v37, %v1365_v53  ;;  %v859_v26 = vmul.f32 %v1576_v13, %v1576_v13 }
 0x126   :  { %367 = vst [vmem:[%s1890_s3 + $0x1c8] sm:$0xff] %v1698_v25 }
 0x127   :  { %v782_v21 = vadd.f32 %v781_v17, %v1389_v60  ;;  %v914_v46 = vadd.f32 %v913_v8, %v851_v35  ;;  %v854_v60 = vmul.f32 %v1434_v11, %v1434_v11  ;;  %v860_v35 = vmul.f32 %v1611_v47, %v1611_v47 }
 0x129   :  { %v783_v12 = vadd.f32 %v782_v21, %v1413_v3  ;;  %v915_v53 = vadd.f32 %v914_v46, %v852_v18  ;;  %v855_v3 = vmul.f32 %v1462_v20, %v1462_v20  ;;  %v259_v8 = vpop.f32.mrf.mxu2 }
 0x12a   :  { %v1749_v18 = vadd.f32 %v1269_v6, %v259_v8 }
 0x12b   :  { %v784_v31 = vadd.f32 %v783_v12, %v1434_v11  ;;  %v916_v34 = vadd.f32 %v915_v53, %v853_v30  ;;  %v292_v11 = vpop.f32.mrf.mxu3  ;;  %v863_v30 = vmul.f32 %v1368_v55, %v1368_v55  ;;  %v864_v53 = vmul.f32 %v1392_v62, %v1392_v62 }
 0x12c   :  { %v1724_v54 = vadd.f32 %v1269_v6, %v292_v11  ;;  %357 = vst [vmem:[%s1890_s3 + $0x178] sm:$0xff] %v1749_v18 }
 0x12d   :  { %v785_v36 = vadd.f32 %v784_v31, %v1462_v20  ;;  %v917_v39 = vadd.f32 %v916_v34, %v854_v60  ;;  %v857_v20 = vmul.f32 %v1516_v38, %v1516_v38 }
 0x12e   :  { %368 = vst [vmem:[%s1890_s3 + $0x1d0] sm:$0xff] %v1724_v54 }
 0x12f   :  { %v786_v40 = vadd.f32 %v785_v36, %v1490_v29  ;;  %v918_v44 = vadd.f32 %v917_v39, %v855_v3  ;;  %v865_v3 = vmul.f32 %v1416_v5, %v1416_v5 }
 0x131   :  { %v787_v61 = vadd.f32 %v786_v40, %v1516_v38  ;;  %v919_v63 = vadd.f32 %v918_v44, %v856_v9  ;;  %v867_v40 = vmul.f32 %v1465_v23, %v1465_v23 }
 0x133   :  { %v920_v29 = vadd.f32 %v919_v63, %v857_v20  ;;  %v788_v1 = vadd.f32 %v787_v61, %v1541_v50  ;;  %v861_v50 = vmul.f32 %v1636_v22, %v1636_v22  ;;  %v295_v17 = vpop.f32.mrf.mxu3 }
 0x134   :  { %v1752_v21 = vadd.f32 %v1269_v6, %v295_v17 }
 0x135   :  { %v921_v4 = vadd.f32 %v920_v29, %v858_v16  ;;  %v789_v38 = vadd.f32 %v788_v1, %v1576_v13 }
 0x136   :  { %369 = vst [vmem:[%s1890_s3 + $0x1d8] sm:$0xff] %v1752_v21 }
 0x137   :  { %v922_v37 = vadd.f32 %v921_v4, %v859_v26  ;;  %v790_v7 = vadd.f32 %v789_v38, %v1611_v47  ;;  %v862_v47 = vmul.f32 %v1341_v45, %v1341_v45  ;;  %v871_v4 = vmul.f32 %v1581_v49, %v1581_v49 }
 0x139   :  { %v923_v46 = vadd.f32 %v922_v37, %v860_v35  ;;  %v791_v13 = vadd.f32 %v790_v7, %v1636_v22 }
 0x13b   :  { %v792_v48 = vadd.f32 %v791_v13, %v1341_v45  ;;  %v924_v43 = vadd.f32 %v923_v46, %v861_v50  ;;  %v298_v34 = vpop.f32.mrf.mxu3 }
 0x13c   :  { %v1773_v45 = vadd.f32 %v1269_v6, %v298_v34 }
 0x13d   :  { %v793_v22 = vadd.f32 %v792_v48, %v1368_v55  ;;  %v925_v12 = vadd.f32 %v924_v43, %v862_v47  ;;  %v866_v55 = vmul.f32 %v1437_v14, %v1437_v14  ;;  %v875_v48 = vmul.f32 %v1695_v59, %v1695_v59 }
 0x13e   :  { %370 = vst [vmem:[%s1890_s3 + $0x1e0] sm:$0xff] %v1773_v45 }
 0x13f   :  { %v794_v60 = vadd.f32 %v793_v22, %v1392_v62  ;;  %v926_v31 = vadd.f32 %v925_v12, %v863_v30  ;;  %v876_v30 = vmul.f32 %v1721_v51, %v1721_v51  ;;  %v877_v22 = vmul.f32 %v1749_v18, %v1749_v18 }
 0x141   :  { %v795_v36 = vadd.f32 %v794_v60, %v1416_v5  ;;  %v927_v39 = vadd.f32 %v926_v31, %v864_v53  ;;  %v868_v5 = vmul.f32 %v1493_v32, %v1493_v32 }
 0x143   :  { %v796_v62 = vadd.f32 %v795_v36, %v1437_v14  ;;  %v928_v9 = vadd.f32 %v927_v39, %v865_v3  ;;  %v301_v20 = vpop.f32.mrf.mxu3  ;;  %v869_v14 = vmul.f32 %v1519_v41, %v1519_v41 }
 0x144   :  { %v1792_v63 = vadd.f32 %v1269_v6, %v301_v20 }
 0x145   :  { %v929_v44 = vadd.f32 %v928_v9, %v866_v55  ;;  %v797_v10 = vadd.f32 %v796_v62, %v1465_v23  ;;  %v870_v23 = vmul.f32 %v1544_v56, %v1544_v56  ;;  %v881_v55 = vmul.f32 %v1522_v42, %v1522_v42 }
 0x146   :  { %371 = vst [vmem:[%s1890_s3 + $0x1e8] sm:$0xff] %v1792_v63 }
 0x147   :  { %v798_v11 = vadd.f32 %v797_v10, %v1493_v32  ;;  %v930_v61 = vadd.f32 %v929_v44, %v867_v40 }
 0x149   :  { %v799_v29 = vadd.f32 %v798_v11, %v1519_v41  ;;  %v931_v1 = vadd.f32 %v930_v61, %v868_v5  ;;  %v872_v41 = vmul.f32 %v1614_v58, %v1614_v58 }
 0x14b   :  { %v800_v32 = vadd.f32 %v799_v29, %v1544_v56  ;;  %v932_v16 = vadd.f32 %v931_v1, %v869_v14  ;;  %v304_v35 = vpop.f32.mrf.mxu3  ;;  %v873_v56 = vmul.f32 %v1639_v27, %v1639_v27 }
 0x14c   :  { %v1811_v50 = vadd.f32 %v1269_v6, %v304_v35  ;;  %v891_v35 = vmul.f32 %v1792_v63, %v1792_v63 }
 0x14d   :  { %v801_v38 = vadd.f32 %v800_v32, %v1581_v49  ;;  %v933_v26 = vadd.f32 %v932_v16, %v870_v23 }
 0x14e   :  { %372 = vst [vmem:[%s1890_s3 + $0x1f0] sm:$0xff] %v1811_v50 }
 0x14f   :  { %v802_v37 = vadd.f32 %v801_v38, %v1614_v58  ;;  %v934_v7 = vadd.f32 %v933_v26, %v871_v4  ;;  %v874_v58 = vmul.f32 %v1669_v0, %v1669_v0  ;;  %v889_v38 = vmul.f32 %v1752_v21, %v1752_v21 }
 0x151   :  { %v803_v8 = vadd.f32 %v802_v37, %v1639_v27  ;;  %v935_v17 = vadd.f32 %v934_v7, %v872_v41  ;;  %v890_v37 = vmul.f32 %v1773_v45, %v1773_v45 }
 0x153   :  { %v936_v49 = vadd.f32 %v935_v17, %v873_v56  ;;  %v804_v46 = vadd.f32 %v803_v8, %v1669_v0  ;;  %v307_v12 = vpop.f32.mrf.mxu3  ;;  %v892_v56 = vmul.f32 %v1811_v50, %v1811_v50 }
 0x154   :  { %v308_v53 = vadd.f32 %v1269_v6, %v307_v12  ;;  %v880_v6 = vmul.f32 %v1496_v33, %v1496_v33 }
 0x155   :  { %v937_v13 = vadd.f32 %v936_v49, %v874_v58  ;;  %v805_v47 = vadd.f32 %v804_v46, %v1695_v59  ;;  %v878_v59 = vmul.f32 %v1440_v15, %v1440_v15 }
 0x156   :  { %373 = vst [vmem:[%s1890_s3 + $0x1f8] sm:$0xff] %v308_v53 }
 0x157   :  { %v938_v43 = vadd.f32 %v937_v13, %v875_v48  ;;  %v806_v27 = vadd.f32 %v805_v47, %v1721_v51  ;;  %v879_v51 = vmul.f32 %v1468_v24, %v1468_v24 }
 0x159   :  { %v939_v60 = vadd.f32 %v938_v43, %v876_v30  ;;  %v807_v0 = vadd.f32 %v806_v27, %v1749_v18 }
 0x15b   :  { %v808_v31 = vadd.f32 %v807_v0, %v1440_v15  ;;  %v940_v34 = vadd.f32 %v939_v60, %v877_v22  ;;  %v882_v15 = vmul.f32 %v1547_v57, %v1547_v57 }
 0x15d   :  { %v809_v3 = vadd.f32 %v808_v31, %v1468_v24  ;;  %v941_v36 = vadd.f32 %v940_v34, %v878_v59  ;;  %v883_v24 = vmul.f32 %v1584_v52, %v1584_v52 }
 0x15f   :  { %v810_v18 = vadd.f32 %v809_v3, %v1496_v33  ;;  %v942_v39 = vadd.f32 %v941_v36, %v879_v51  ;;  %v884_v33 = vmul.f32 %v1617_v19, %v1617_v19 }
 0x161   :  { %v811_v62 = vadd.f32 %v810_v18, %v1522_v42  ;;  %v943_v9 = vadd.f32 %v942_v39, %v880_v6  ;;  %v885_v42 = vmul.f32 %v1642_v2, %v1642_v2 }
 0x163   :  { %v812_v40 = vadd.f32 %v811_v62, %v1547_v57  ;;  %v944_v44 = vadd.f32 %v943_v9, %v881_v55  ;;  %v886_v57 = vmul.f32 %v1672_v28, %v1672_v28 }
 0x165   :  { %v945_v10 = vadd.f32 %v944_v44, %v882_v15  ;;  %v813_v5 = vadd.f32 %v812_v40, %v1584_v52  ;;  %v887_v52 = vmul.f32 %v1698_v25, %v1698_v25 }
 0x167   :  { %v814_v11 = vadd.f32 %v813_v5, %v1617_v19  ;;  %v946_v61 = vadd.f32 %v945_v10, %v883_v24  ;;  %v888_v19 = vmul.f32 %v1724_v54, %v1724_v54 }
 0x169   :  { %v815_v20 = vadd.f32 %v814_v11, %v1642_v2  ;;  %v947_v14 = vadd.f32 %v946_v61, %v884_v33 }
 0x16b   :  { %v816_v29 = vadd.f32 %v815_v20, %v1672_v28  ;;  %v948_v1 = vadd.f32 %v947_v14, %v885_v42 }
 0x16d   :  { %v817_v23 = vadd.f32 %v816_v29, %v1698_v25  ;;  %v949_v32 = vadd.f32 %v948_v1, %v886_v57 }
 0x16f   :  { %v818_v16 = vadd.f32 %v817_v23, %v1724_v54  ;;  %v950_v4 = vadd.f32 %v949_v32, %v887_v52 }
 0x171   :  { %v819_v2 = vadd.f32 %v818_v16, %v1752_v21  ;;  %v951_v26 = vadd.f32 %v950_v4, %v888_v19  ;;  %v893_v21 = vmul.f32 %v308_v53, %v308_v53 }
 0x173   :  { %v952_v28 = vadd.f32 %v951_v26, %v889_v38  ;;  %v820_v41 = vadd.f32 %v819_v2, %v1773_v45 }
 0x175   :  { %v953_v25 = vadd.f32 %v952_v28, %v890_v37  ;;  %v821_v7 = vadd.f32 %v820_v41, %v1792_v63 }
 0x177   :  { %v954_v54 = vadd.f32 %v953_v25, %v891_v35  ;;  %v822_v8 = vadd.f32 %v821_v7, %v1811_v50 }
 0x179   :  { %v955_v17 = vadd.f32 %v954_v54, %v892_v56  ;;  %v823_v49 = vadd.f32 %v822_v8, %v308_v53 }
 0x17b   :  { %v824_v46 = vrot.slane %v823_v49, 4  ;;  %v956_v58 = vadd.f32 %v955_v17, %v893_v21 }
 0x17d   :  { %v825_v13 = vadd.f32 %v824_v46, %v823_v49  ;;  %v957_v47 = vrot.slane %v956_v58, 4 }
 0x17f   :  { %v826_v45 = vrot.slane %v825_v13, 2  ;;  %v958_v48 = vadd.f32 %v957_v47, %v956_v58 }
 0x181   :  { %v827_v43 = vadd.f32 %v826_v45, %v825_v13  ;;  %v959_v27 = vrot.slane %v958_v48, 2 }
 0x183   :  { %v828_v30 = vrot.slane %v827_v43, 1  ;;  %v960_v22 = vadd.f32 %v959_v27, %v958_v48 }
 0x185   :  { %v829_v63 = vadd.f32 %v828_v30, %v827_v43  ;;  %v961_v12 = vrot.slane %v960_v22, 1 }
 0x187   :  { %v962_v60 = vadd.f32 %v961_v12, %v960_v22  ;;  %963 = vst [vmem:[%s1891_s4] sm:$0xff] %v829_v63 }
 0x189   :  { %964 = vst [vmem:[%s1892_s5] sm:$0xff] %v962_v60 }

</bundles_post_ra>
